<compile_context>
chip_gen: v6e
topology: v6e:2x2x1
jax: 0.10.0
libtpu: 0.0.40
codegen_flags: <defaults>
</compile_context>

<pallas_src>
import functools

import jax
import jax.numpy as jnp
from jax.experimental import pallas as pl
from jax.experimental.pallas import tpu as pltpu

HIDDEN_SIZE = 64
INPUT_SIZE = 188
NUM_LAYERS = 2
OUTPUT_SIZE = 188


def _round_up(n, m):
    return ((n + m - 1) // m) * m


def _pick_time_chunk(t, max_chunk=32):
    """Largest divisor of t that is <= max_chunk."""
    for c in range(min(t, max_chunk), 0, -1):
        if t % c == 0:
            return c
    return 1


# ----------------------------------------------------------------------------
# Pre-pass: layer-0 input projection over ALL timesteps (one batched matmul).
# x2d: (T*B_pad, I_pad), w: (I_pad, 4H), b: (1, 4H) -> (T*B_pad, 4H) f32.
# ----------------------------------------------------------------------------
def _proj_kernel(x_ref, w_ref, b_ref, out_ref):
    out_ref[...] = (
        jnp.dot(x_ref[...].astype(w_ref.dtype), w_ref[...],
                preferred_element_type=jnp.float32)
        + b_ref[...]
    )


# ----------------------------------------------------------------------------
# Recurrent pass: one grid step per time-chunk; fori_loop over timesteps.
# ----------------------------------------------------------------------------
def _lstm_recurrent_kernel(xproj_ref, whh0_ref, w1_ref, b1_ref,
                           fcw_ref, fcb_ref, out_ref, state_s,
                           *, hidden, tc, b_pad):
    H = hidden
    chunk = pl.program_id(0)

    @pl.when(chunk == 0)
    def _init():
        state_s[...] = jnp.zeros_like(state_s)

    # Loop-invariant loads / broadcasts hoisted out of the time loop.
    whh0 = whh0_ref[...]                                  # (H, 4H)
    w1 = w1_ref[...]                                      # (2H, 4H)
    b1 = jnp.broadcast_to(b1_ref[...], (b_pad, 4 * H))    # broadcast once

    def act(gates, c):
        # Columns were permuted at init to (i, f, o, g): one wide sigmoid,
        # one tanh launch per cell instead of four 64-lane activations.
        s = jax.nn.sigmoid(gates[:, : 3 * H])
        g = jnp.tanh(gates[:, 3 * H:])
        i = s[:, 0:H]
        f = s[:, H:2 * H]
        o = s[:, 2 * H:3 * H]
        c_new = f * c + i * g
        h_new = o * jnp.tanh(c_new)
        return h_new, c_new

    def step(tt, carry):
        h0, c0, h1, c1 = carry
        # Layer 0: x_t @ W_ih0 + b0 was precomputed; only the hidden
        # recurrence matmul remains on the serial chain.
        gates0 = xproj_ref[tt] + jnp.dot(
            h0.astype(whh0.dtype), whh0, preferred_element_type=jnp.float32)
        h0, c0 = act(gates0, c0)
        # Layer 1: single fused matmul on concat([h0, h1]) vs [[Wih1],[Whh1]].
        xin1 = jnp.concatenate([h0, h1], axis=-1).astype(w1.dtype)
        gates1 = jnp.dot(xin1, w1, preferred_element_type=jnp.float32) + b1
        h1, c1 = act(gates1, c1)
        return h0, c0, h1, c1

    carry = (state_s[0], state_s[1], state_s[2], state_s[3])
    h0, c0, h1, c1 = jax.lax.fori_loop(0, tc, step, carry, unroll=True)
    state_s[0] = h0
    state_s[1] = c0
    state_s[2] = h1
    state_s[3] = c1

    @pl.when(chunk == pl.num_programs(0) - 1)
    def _final():
        y = jnp.dot(h1.astype(fcw_ref.dtype), fcw_ref[...],
                    preferred_element_type=jnp.float32) + fcb_ref[...]
        out_ref[...] = y.astype(out_ref.dtype)


# ----------------------------------------------------------------------------
# Wrapper
# ----------------------------------------------------------------------------
def lstm_model_forward(x, kp, *, time_chunk=None):
    """x: (B, T, INPUT_SIZE) f32 -> (B, OUTPUT_SIZE) f32."""
    B, T, I = x.shape
    H = HIDDEN_SIZE
    O = OUTPUT_SIZE
    I_pad = _round_up(I, 128)
    O_pad = kp["fcw"].shape[1]
    B_pad = _round_up(B, 8)

    tc = time_chunk if time_chunk is not None else _pick_time_chunk(T)
    assert T % tc == 0

    # (B, T, I) -> (T, B_pad, I_pad), zero-padded (exact: padded weight rows
    # and bias columns are zero).
    x_tbi = jnp.transpose(x, (1, 0, 2))
    x_tbi = jnp.pad(x_tbi, ((0, 0), (0, B_pad - B), (0, I_pad - I)))
    x2d = x_tbi.reshape(T * B_pad, I_pad)

    rows = tc * B_pad

    xproj2d = pl.pallas_call(
        _proj_kernel,
        out_shape=jax.ShapeDtypeStruct((T * B_pad, 4 * H), jnp.float32),
        grid_spec=pltpu.PrefetchScalarGridSpec(
            num_scalar_prefetch=0,
            grid=(T // tc,),
            in_specs=[
                pl.BlockSpec((rows, I_pad), lambda i: (i, 0)),
                pl.BlockSpec((I_pad, 4 * H), lambda i: (0, 0)),
                pl.BlockSpec((1, 4 * H), lambda i: (0, 0)),
            ],
            out_specs=pl.BlockSpec((rows, 4 * H), lambda i: (i, 0)),
        ),
        compiler_params=pltpu.CompilerParams(
            dimension_semantics=("parallel",)),
    )(x2d, kp["wih0"], kp["b0"])
    xproj = xproj2d.reshape(T, B_pad, 4 * H)

    kernel = functools.partial(
        _lstm_recurrent_kernel, hidden=H, tc=tc, b_pad=B_pad)

    out_pad = pl.pallas_call(
        kernel,
        out_shape=jax.ShapeDtypeStruct((B_pad, O_pad), jnp.float32),
        grid_spec=pltpu.PrefetchScalarGridSpec(
            num_scalar_prefetch=0,
            grid=(T // tc,),
            in_specs=[
                # per-chunk layer-0 gate pre-activations
                pl.BlockSpec((tc, B_pad, 4 * H), lambda c: (c, 0, 0)),
                # invariant weights (constant block index -> resident in VMEM)
                pl.BlockSpec((H, 4 * H), lambda c: (0, 0)),       # W_hh layer 0
                pl.BlockSpec((2 * H, 4 * H), lambda c: (0, 0)),   # [Wih1; Whh1]
                pl.BlockSpec((1, 4 * H), lambda c: (0, 0)),       # bias layer 1
                pl.BlockSpec((H, O_pad), lambda c: (0, 0)),       # fc weight
                pl.BlockSpec((1, O_pad), lambda c: (0, 0)),       # fc bias
            ],
            out_specs=pl.BlockSpec((B_pad, O_pad), lambda c: (0, 0)),
            scratch_shapes=[
                pltpu.VMEM((4, B_pad, H), jnp.float32),  # h0, c0, h1, c1
            ],
        ),
        compiler_params=pltpu.CompilerParams(
            dimension_semantics=("arbitrary",)),  # time recurrence is serial
    )(xproj, kp["whh0"], kp["w1cat"], kp["b1"], kp["fcw"], kp["fcb"])

    return out_pad[:B, :O]


# ----------------------------------------------------------------------------
# Parameters
# ----------------------------------------------------------------------------
def init_params(key):
    """Raw params in PyTorch layout: weight_ih (4H,in), weight_hh (4H,H),
    bias_ih/bias_hh (4H,), fc.weight (O,H), fc.bias (O,). Gate order i,f,g,o."""
    H, I, O = HIDDEN_SIZE, INPUT_SIZE, OUTPUT_SIZE
    bound = 1.0 / jnp.sqrt(jnp.float32(H))
    ks = jax.random.split(key, 10)

    def u(k, shape):
        return jax.random.uniform(k, shape, jnp.float32, -bound, bound)

    return (u(ks[0], (4 * H, I)), u(ks[1], (4 * H, H)),
            u(ks[2], (4 * H,)), u(ks[3], (4 * H,)),
            u(ks[4], (4 * H, H)), u(ks[5], (4 * H, H)),
            u(ks[6], (4 * H,)), u(ks[7], (4 * H,)),
            u(ks[8], (O, H)), u(ks[9], (O,)))


def prepare_params(raw, use_bf16=False):
    """Convert PyTorch-layout params to kernel layout:
    transpose to (in,4H), permute gate columns (i,f,g,o)->(i,f,o,g), fold
    b_ih+b_hh, concat layer-1 weights, zero-pad I and O to 128-multiples,
    optionally cast weight matrices to bf16 (biases/accumulation stay f32)."""
    (w_ih0, w_hh0, b_ih0, b_hh0,
     w_ih1, w_hh1, b_ih1, b_hh1, fc_w, fc_b) = raw
    H = HIDDEN_SIZE
    I_pad = _round_up(INPUT_SIZE, 128)
    O_pad = _round_up(OUTPUT_SIZE, 128)
    perm = jnp.concatenate([jnp.arange(0, H), jnp.arange(H, 2 * H),
                            jnp.arange(3 * H, 4 * H), jnp.arange(2 * H, 3 * H)])
    wdt = jnp.bfloat16 if use_bf16 else jnp.float32

    wih0 = jnp.transpose(w_ih0)[:, perm]                      # (I, 4H)
    wih0 = jnp.pad(wih0, ((0, I_pad - INPUT_SIZE), (0, 0))).astype(wdt)
    whh0 = jnp.transpose(w_hh0)[:, perm].astype(wdt)          # (H, 4H)
    b0 = (b_ih0 + b_hh0)[perm][None, :].astype(jnp.float32)   # (1, 4H)

    w1cat = jnp.concatenate(
        [jnp.transpose(w_ih1), jnp.transpose(w_hh1)], axis=0)[:, perm]
    w1cat = w1cat.astype(wdt)                                 # (2H, 4H)
    b1 = (b_ih1 + b_hh1)[perm][None, :].astype(jnp.float32)   # (1, 4H)

    fcw = jnp.pad(jnp.transpose(fc_w),
                  ((0, 0), (0, O_pad - OUTPUT_SIZE))).astype(wdt)  # (H, O_pad)
    fcb = jnp.pad(fc_b, (0, O_pad - OUTPUT_SIZE))[None, :].astype(jnp.float32)

    return dict(wih0=wih0, b0=b0, whh0=whh0, w1cat=w1cat, b1=b1,
                fcw=fcw, fcb=fcb)


# ----------------------------------------------------------------------------
# Pure-JAX reference (PyTorch semantics, f32, gate order i,f,g,o)
# ----------------------------------------------------------------------------
def reference_forward(x, raw):
    (w_ih0, w_hh0, b_ih0, b_hh0,
     w_ih1, w_hh1, b_ih1, b_hh1, fc_w, fc_b) = raw
    B, T, _ = x.shape
    H = HIDDEN_SIZE
    hi = jax.lax.Precision.HIGHEST

    def cell(xin, h, c, w_ih, w_hh, b_ih, b_hh):
        gates = (jnp.dot(xin, w_ih.T, precision=hi)
                 + jnp.dot(h, w_hh.T, precision=hi) + b_ih + b_hh)
        i = jax.nn.sigmoid(gates[:, 0:H])
        f = jax.nn.sigmoid(gates[:, H:2 * H])
        g = jnp.tanh(gates[:, 2 * H:3 * H])
        o = jax.nn.sigmoid(gates[:, 3 * H:4 * H])
        c_new = f * c + i * g
        return o * jnp.tanh(c_new), c_new

    h0 = jnp.zeros((B, H), jnp.float32)
    c0 = jnp.zeros((B, H), jnp.float32)
    h1 = jnp.zeros((B, H), jnp.float32)
    c1 = jnp.zeros((B, H), jnp.float32)
    for t in range(T):
        h0, c0 = cell(x[:, t, :], h0, c0, w_ih0, w_hh0, b_ih0, b_hh0)
        h1, c1 = cell(h0, h1, c1, w_ih1, w_hh1, b_ih1, b_hh1)
    return jnp.dot(h1, fc_w.T, precision=hi) + fc_b


if __name__ == "__main__":
    key = jax.random.PRNGKey(0)
    pkey, xkey = jax.random.split(key)

    raw = init_params(pkey)

    B, T = 2, 8
    x = jax.random.normal(xkey, (B, T, INPUT_SIZE), jnp.float32)

    ref = reference_forward(x, raw)

    fwd = jax.jit(lstm_model_forward)

    # f32 path (default; matches PyTorch f32 semantics closely)
    kp32 = prepare_params(raw, use_bf16=False)
    out32 = jax.block_until_ready(fwd(x, kp32))
    assert out32.shape == (B, OUTPUT_SIZE)
    assert jnp.allclose(out32, ref, atol=5e-4, rtol=5e-4), "f32 mismatch"

    # bf16-weight MXU path (v6e/v7x fast path); f32 accumulation & state,
    # so only a small quantization error vs. the f32 reference.
    kpbf = prepare_params(raw, use_bf16=True)
    outbf = jax.block_until_ready(fwd(x, kpbf))
    assert outbf.shape == (B, OUTPUT_SIZE)
    assert float(jnp.max(jnp.abs(outbf - ref))) < 0.2, "bf16 mismatch"

    print("KERNEL_OK")
</pallas_src>

<mosaic_0001>
module attributes {stable_mosaic.version = 11 : i64} {
  func.func @_proj_kernel(%arg0: i32, %arg1: memref<64x256xf32, #tpu.memory_space<vmem>>, %arg2: memref<256x256xf32, #tpu.memory_space<vmem>>, %arg3: memref<1x256xf32, #tpu.memory_space<vmem>>, %arg4: memref<64x256xf32, #tpu.memory_space<vmem>>) attributes {dimension_semantics = [#tpu.dimension_semantics<parallel>], iteration_bounds = array<i64: 1>, scalar_prefetch = 0 : i64, scratch_operands = 0 : i64, tpu.core_type = #tpu.core_type<tc>, window_params = [{transform_indices = @transform_0, window_bounds = array<i64: 64, 256>}, {pipeline_mode = #tpu.pipeline_mode<synchronous>, transform_indices = @transform_1, window_bounds = array<i64: 256, 256>}, {pipeline_mode = #tpu.pipeline_mode<synchronous>, transform_indices = @transform_2, window_bounds = array<i64: 1, 256>}, {transform_indices = @transform_3, window_bounds = array<i64: 64, 256>}]} {
    %c0 = arith.constant 0 : index
    %c0_0 = arith.constant 0 : index
    %0 = vector.load %arg1[%c0, %c0_0] : memref<64x256xf32, #tpu.memory_space<vmem>>, vector<64x256xf32>
    %c0_1 = arith.constant 0 : index
    %c0_2 = arith.constant 0 : index
    %1 = vector.load %arg2[%c0_1, %c0_2] : memref<256x256xf32, #tpu.memory_space<vmem>>, vector<256x256xf32>
    %cst = arith.constant dense<0.000000e+00> : vector<64x256xf32>
    %2 = tpu.matmul %0, %1, %cst {dimension_numbers = #tpu.dot_dimension_numbers<[1], [0], [0], [1], [0, 0, 1, 1], [], []>} : vector<64x256xf32>, vector<256x256xf32>, vector<64x256xf32> -> vector<64x256xf32>
    %c0_3 = arith.constant 0 : index
    %c0_4 = arith.constant 0 : index
    %3 = vector.load %arg3[%c0_3, %c0_4] : memref<1x256xf32, #tpu.memory_space<vmem>>, vector<1x256xf32>
    %4 = vector.broadcast %3 : vector<1x256xf32> to vector<64x256xf32>
    %5 = arith.addf %2, %4 : vector<64x256xf32>
    %c0_5 = arith.constant 0 : index
    %c0_6 = arith.constant 0 : index
    %6 = vector.load %arg4[%c0_5, %c0_6] : memref<64x256xf32, #tpu.memory_space<vmem>>, vector<64x256xf32>
    tpu.vector_store %arg4[%c0_5, %c0_6], %5 {strides = array<i32>} : memref<64x256xf32, #tpu.memory_space<vmem>>, vector<64x256xf32>,
    return
  }
  func.func @transform_0(%arg0: i32) -> (i32, i32) {
    %c0_i32 = arith.constant 0 : i32
    %c0_i32_0 = arith.constant 0 : i32
    return %arg0, %c0_i32 : i32, i32
  }
  func.func @transform_1(%arg0: i32) -> (i32, i32) {
    %c0_i32 = arith.constant 0 : i32
    %c0_i32_0 = arith.constant 0 : i32
    %c0_i32_1 = arith.constant 0 : i32
    return %c0_i32, %c0_i32_0 : i32, i32
  }
  func.func @transform_2(%arg0: i32) -> (i32, i32) {
    %c0_i32 = arith.constant 0 : i32
    %c0_i32_0 = arith.constant 0 : i32
    %c0_i32_1 = arith.constant 0 : i32
    return %c0_i32, %c0_i32_0 : i32, i32
  }
  func.func @transform_3(%arg0: i32) -> (i32, i32) {
    %c0_i32 = arith.constant 0 : i32
    %c0_i32_0 = arith.constant 0 : i32
    return %arg0, %c0_i32 : i32, i32
  }
}

module attributes {stable_mosaic.version = 11 : i64} {
  func.func @_lstm_recurrent_kernel(%arg0: i32, %arg1: memref<8x8x256xf32, #tpu.memory_space<vmem>>, %arg2: memref<64x256xf32, #tpu.memory_space<vmem>>, %arg3: memref<128x256xf32, #tpu.memory_space<vmem>>, %arg4: memref<1x256xf32, #tpu.memory_space<vmem>>, %arg5: memref<64x256xf32, #tpu.memory_space<vmem>>, %arg6: memref<1x256xf32, #tpu.memory_space<vmem>>, %arg7: memref<8x256xf32, #tpu.memory_space<vmem>>, %arg8: memref<4x8x64xf32, #tpu.memory_space<vmem>>) attributes {dimension_semantics = [#tpu.dimension_semantics<arbitrary>], iteration_bounds = array<i64: 1>, scalar_prefetch = 0 : i64, scratch_operands = 1 : i64, tpu.core_type = #tpu.core_type<tc>, window_params = [{transform_indices = @transform_0, window_bounds = array<i64: 8, 8, 256>}, {pipeline_mode = #tpu.pipeline_mode<synchronous>, transform_indices = @transform_1, window_bounds = array<i64: 64, 256>}, {pipeline_mode = #tpu.pipeline_mode<synchronous>, transform_indices = @transform_2, window_bounds = array<i64: 128, 256>}, {pipeline_mode = #tpu.pipeline_mode<synchronous>, transform_indices = @transform_3, window_bounds = array<i64: 1, 256>}, {pipeline_mode = #tpu.pipeline_mode<synchronous>, transform_indices = @transform_4, window_bounds = array<i64: 64, 256>}, {pipeline_mode = #tpu.pipeline_mode<synchronous>, transform_indices = @transform_5, window_bounds = array<i64: 1, 256>}, {pipeline_mode = #tpu.pipeline_mode<synchronous>, transform_indices = @transform_6, window_bounds = array<i64: 8, 256>}]} {
    %c0_i32 = arith.constant 0 : i32
    %0 = arith.cmpi eq, %arg0, %c0_i32 : i32
    %1 = arith.extui %0 : i1 to i32
    %c0_i32_0 = arith.constant 0 : i32
    %2 = arith.cmpi ne, %1, %c0_i32_0 : i32
    scf.if %2 {
      %cst_77 = arith.constant 0.000000e+00 : f32
      %351 = vector.broadcast %cst_77 : f32 to vector<4x8x64xf32>
      %c0_78 = arith.constant 0 : index
      %c0_79 = arith.constant 0 : index
      %c0_80 = arith.constant 0 : index
      %352 = vector.load %arg8[%c0_78, %c0_79, %c0_80] : memref<4x8x64xf32, #tpu.memory_space<vmem>>, vector<4x8x64xf32>
      tpu.vector_store %arg8[%c0_78, %c0_79, %c0_80], %351 {strides = array<i32>} : memref<4x8x64xf32, #tpu.memory_space<vmem>>, vector<4x8x64xf32>,
    } else {
    }
    %c0 = arith.constant 0 : index
    %c0_1 = arith.constant 0 : index
    %3 = vector.load %arg2[%c0, %c0_1] : memref<64x256xf32, #tpu.memory_space<vmem>>, vector<64x256xf32>
    %c0_2 = arith.constant 0 : index
    %c0_3 = arith.constant 0 : index
    %4 = vector.load %arg3[%c0_2, %c0_3] : memref<128x256xf32, #tpu.memory_space<vmem>>, vector<128x256xf32>
    %c0_4 = arith.constant 0 : index
    %c0_5 = arith.constant 0 : index
    %5 = vector.load %arg4[%c0_4, %c0_5] : memref<1x256xf32, #tpu.memory_space<vmem>>, vector<1x256xf32>
    %6 = vector.shape_cast %5 : vector<1x256xf32> to vector<1x256xf32>
    %7 = vector.broadcast %6 : vector<1x256xf32> to vector<8x256xf32>
    %c0_6 = arith.constant 0 : index
    %c0_7 = arith.constant 0 : index
    %c0_8 = arith.constant 0 : index
    %8 = vector.load %arg8[%c0_6, %c0_7, %c0_8] : memref<4x8x64xf32, #tpu.memory_space<vmem>>, vector<1x8x64xf32>
    %9 = vector.shape_cast %8 : vector<1x8x64xf32> to vector<8x64xf32>
    %c1 = arith.constant 1 : index
    %c0_9 = arith.constant 0 : index
    %c0_10 = arith.constant 0 : index
    %10 = vector.load %arg8[%c1, %c0_9, %c0_10] : memref<4x8x64xf32, #tpu.memory_space<vmem>>, vector<1x8x64xf32>
    %11 = vector.shape_cast %10 : vector<1x8x64xf32> to vector<8x64xf32>
    %c2 = arith.constant 2 : index
    %c0_11 = arith.constant 0 : index
    %c0_12 = arith.constant 0 : index
    %12 = vector.load %arg8[%c2, %c0_11, %c0_12] : memref<4x8x64xf32, #tpu.memory_space<vmem>>, vector<1x8x64xf32>
    %13 = vector.shape_cast %12 : vector<1x8x64xf32> to vector<8x64xf32>
    %c3 = arith.constant 3 : index
    %c0_13 = arith.constant 0 : index
    %c0_14 = arith.constant 0 : index
    %14 = vector.load %arg8[%c3, %c0_13, %c0_14] : memref<4x8x64xf32, #tpu.memory_space<vmem>>, vector<1x8x64xf32>
    %15 = vector.shape_cast %14 : vector<1x8x64xf32> to vector<8x64xf32>
    %c0_i32_15 = arith.constant 0 : i32
    %16 = arith.index_cast %c0_i32_15 : i32 to index
    %c0_16 = arith.constant 0 : index
    %c0_17 = arith.constant 0 : index
    %17 = vector.load %arg1[%16, %c0_16, %c0_17] : memref<8x8x256xf32, #tpu.memory_space<vmem>>, vector<1x8x256xf32>
    %18 = vector.shape_cast %17 : vector<1x8x256xf32> to vector<8x256xf32>
    %cst = arith.constant dense<0.000000e+00> : vector<8x256xf32>
    %19 = tpu.matmul %9, %3, %cst {dimension_numbers = #tpu.dot_dimension_numbers<[1], [0], [0], [1], [0, 0, 1, 1], [], []>} : vector<8x64xf32>, vector<64x256xf32>, vector<8x256xf32> -> vector<8x256xf32>
    %20 = arith.addf %18, %19 : vector<8x256xf32>
    %21 = vector.extract_strided_slice %20 {offsets = [0, 0], sizes = [8, 192], strides = [1, 1]} : vector<8x256xf32> to vector<8x192xf32>
    %22 = arith.negf %21 : vector<8x192xf32>
    %23 = math.exp %22 : vector<8x192xf32>
    %cst_18 = arith.constant 1.000000e+00 : f32
    %24 = vector.broadcast %cst_18 : f32 to vector<8x192xf32>
    %25 = arith.addf %24, %23 : vector<8x192xf32>
    %26 = arith.divf %24, %25 : vector<8x192xf32>
    %27 = vector.extract_strided_slice %20 {offsets = [0, 192], sizes = [8, 64], strides = [1, 1]} : vector<8x256xf32> to vector<8x64xf32>
    %28 = math.tanh %27 : vector<8x64xf32>
    %29 = vector.extract_strided_slice %26 {offsets = [0, 0], sizes = [8, 64], strides = [1, 1]} : vector<8x192xf32> to vector<8x64xf32>
    %30 = vector.extract_strided_slice %26 {offsets = [0, 64], sizes = [8, 64], strides = [1, 1]} : vector<8x192xf32> to vector<8x64xf32>
    %31 = vector.extract_strided_slice %26 {offsets = [0, 128], sizes = [8, 64], strides = [1, 1]} : vector<8x192xf32> to vector<8x64xf32>
    %32 = arith.mulf %30, %11 : vector<8x64xf32>
    %33 = arith.mulf %29, %28 : vector<8x64xf32>
    %34 = arith.addf %32, %33 : vector<8x64xf32>
    %35 = math.tanh %34 : vector<8x64xf32>
    %36 = arith.mulf %31, %35 : vector<8x64xf32>
    %37 = tpu.concatenate %36, %13 in 1 : vector<8x64xf32>, vector<8x64xf32> -> vector<8x128xf32>
    %cst_19 = arith.constant dense<0.000000e+00> : vector<8x256xf32>
    %38 = tpu.matmul %37, %4, %cst_19 {dimension_numbers = #tpu.dot_dimension_numbers<[1], [0], [0], [1], [0, 0, 1, 1], [], []>} : vector<8x128xf32>, vector<128x256xf32>, vector<8x256xf32> -> vector<8x256xf32>
    %39 = arith.addf %38, %7 : vector<8x256xf32>
    %40 = vector.extract_strided_slice %39 {offsets = [0, 0], sizes = [8, 192], strides = [1, 1]} : vector<8x256xf32> to vector<8x192xf32>
    %41 = arith.negf %40 : vector<8x192xf32>
    %42 = math.exp %41 : vector<8x192xf32>
    %cst_20 = arith.constant 1.000000e+00 : f32
    %43 = vector.broadcast %cst_20 : f32 to vector<8x192xf32>
    %44 = arith.addf %43, %42 : vector<8x192xf32>
    %45 = arith.divf %43, %44 : vector<8x192xf32>
    %46 = vector.extract_strided_slice %39 {offsets = [0, 192], sizes = [8, 64], strides = [1, 1]} : vector<8x256xf32> to vector<8x64xf32>
    %47 = math.tanh %46 : vector<8x64xf32>
    %48 = vector.extract_strided_slice %45 {offsets = [0, 0], sizes = [8, 64], strides = [1, 1]} : vector<8x192xf32> to vector<8x64xf32>
    %49 = vector.extract_strided_slice %45 {offsets = [0, 64], sizes = [8, 64], strides = [1, 1]} : vector<8x192xf32> to vector<8x64xf32>
    %50 = vector.extract_strided_slice %45 {offsets = [0, 128], sizes = [8, 64], strides = [1, 1]} : vector<8x192xf32> to vector<8x64xf32>
    %51 = arith.mulf %49, %15 : vector<8x64xf32>
    %52 = arith.mulf %48, %47 : vector<8x64xf32>
    %53 = arith.addf %51, %52 : vector<8x64xf32>
    %54 = math.tanh %53 : vector<8x64xf32>
    %55 = arith.mulf %50, %54 : vector<8x64xf32>
    %c1_i32 = arith.constant 1 : i32
    %56 = arith.index_cast %c1_i32 : i32 to index
    %c0_21 = arith.constant 0 : index
    %c0_22 = arith.constant 0 : index
    %57 = vector.load %arg1[%56, %c0_21, %c0_22] : memref<8x8x256xf32, #tpu.memory_space<vmem>>, vector<1x8x256xf32>
    %58 = vector.shape_cast %57 : vector<1x8x256xf32> to vector<8x256xf32>
    %cst_23 = arith.constant dense<0.000000e+00> : vector<8x256xf32>
    %59 = tpu.matmul %36, %3, %cst_23 {dimension_numbers = #tpu.dot_dimension_numbers<[1], [0], [0], [1], [0, 0, 1, 1], [], []>} : vector<8x64xf32>, vector<64x256xf32>, vector<8x256xf32> -> vector<8x256xf32>
    %60 = arith.addf %58, %59 : vector<8x256xf32>
    %61 = vector.extract_strided_slice %60 {offsets = [0, 0], sizes = [8, 192], strides = [1, 1]} : vector<8x256xf32> to vector<8x192xf32>
    %62 = arith.negf %61 : vector<8x192xf32>
    %63 = math.exp %62 : vector<8x192xf32>
    %cst_24 = arith.constant 1.000000e+00 : f32
    %64 = vector.broadcast %cst_24 : f32 to vector<8x192xf32>
    %65 = arith.addf %64, %63 : vector<8x192xf32>
    %66 = arith.divf %64, %65 : vector<8x192xf32>
    %67 = vector.extract_strided_slice %60 {offsets = [0, 192], sizes = [8, 64], strides = [1, 1]} : vector<8x256xf32> to vector<8x64xf32>
    %68 = math.tanh %67 : vector<8x64xf32>
    %69 = vector.extract_strided_slice %66 {offsets = [0, 0], sizes = [8, 64], strides = [1, 1]} : vector<8x192xf32> to vector<8x64xf32>
    %70 = vector.extract_strided_slice %66 {offsets = [0, 64], sizes = [8, 64], strides = [1, 1]} : vector<8x192xf32> to vector<8x64xf32>
    %71 = vector.extract_strided_slice %66 {offsets = [0, 128], sizes = [8, 64], strides = [1, 1]} : vector<8x192xf32> to vector<8x64xf32>
    %72 = arith.mulf %70, %34 : vector<8x64xf32>
    %73 = arith.mulf %69, %68 : vector<8x64xf32>
    %74 = arith.addf %72, %73 : vector<8x64xf32>
    %75 = math.tanh %74 : vector<8x64xf32>
    %76 = arith.mulf %71, %75 : vector<8x64xf32>
    %77 = tpu.concatenate %76, %55 in 1 : vector<8x64xf32>, vector<8x64xf32> -> vector<8x128xf32>
    %cst_25 = arith.constant dense<0.000000e+00> : vector<8x256xf32>
    %78 = tpu.matmul %77, %4, %cst_25 {dimension_numbers = #tpu.dot_dimension_numbers<[1], [0], [0], [1], [0, 0, 1, 1], [], []>} : vector<8x128xf32>, vector<128x256xf32>, vector<8x256xf32> -> vector<8x256xf32>
    %79 = arith.addf %78, %7 : vector<8x256xf32>
    %80 = vector.extract_strided_slice %79 {offsets = [0, 0], sizes = [8, 192], strides = [1, 1]} : vector<8x256xf32> to vector<8x192xf32>
    %81 = arith.negf %80 : vector<8x192xf32>
    %82 = math.exp %81 : vector<8x192xf32>
    %cst_26 = arith.constant 1.000000e+00 : f32
    %83 = vector.broadcast %cst_26 : f32 to vector<8x192xf32>
    %84 = arith.addf %83, %82 : vector<8x192xf32>
    %85 = arith.divf %83, %84 : vector<8x192xf32>
    %86 = vector.extract_strided_slice %79 {offsets = [0, 192], sizes = [8, 64], strides = [1, 1]} : vector<8x256xf32> to vector<8x64xf32>
    %87 = math.tanh %86 : vector<8x64xf32>
    %88 = vector.extract_strided_slice %85 {offsets = [0, 0], sizes = [8, 64], strides = [1, 1]} : vector<8x192xf32> to vector<8x64xf32>
    %89 = vector.extract_strided_slice %85 {offsets = [0, 64], sizes = [8, 64], strides = [1, 1]} : vector<8x192xf32> to vector<8x64xf32>
    %90 = vector.extract_strided_slice %85 {offsets = [0, 128], sizes = [8, 64], strides = [1, 1]} : vector<8x192xf32> to vector<8x64xf32>
    %91 = arith.mulf %89, %53 : vector<8x64xf32>
    %92 = arith.mulf %88, %87 : vector<8x64xf32>
    %93 = arith.addf %91, %92 : vector<8x64xf32>
    %94 = math.tanh %93 : vector<8x64xf32>
    %95 = arith.mulf %90, %94 : vector<8x64xf32>
    %c2_i32 = arith.constant 2 : i32
    %96 = arith.index_cast %c2_i32 : i32 to index
    %c0_27 = arith.constant 0 : index
    %c0_28 = arith.constant 0 : index
    %97 = vector.load %arg1[%96, %c0_27, %c0_28] : memref<8x8x256xf32, #tpu.memory_space<vmem>>, vector<1x8x256xf32>
    %98 = vector.shape_cast %97 : vector<1x8x256xf32> to vector<8x256xf32>
    %cst_29 = arith.constant dense<0.000000e+00> : vector<8x256xf32>
    %99 = tpu.matmul %76, %3, %cst_29 {dimension_numbers = #tpu.dot_dimension_numbers<[1], [0], [0], [1], [0, 0, 1, 1], [], []>} : vector<8x64xf32>, vector<64x256xf32>, vector<8x256xf32> -> vector<8x256xf32>
    %100 = arith.addf %98, %99 : vector<8x256xf32>
    %101 = vector.extract_strided_slice %100 {offsets = [0, 0], sizes = [8, 192], strides = [1, 1]} : vector<8x256xf32> to vector<8x192xf32>
    %102 = arith.negf %101 : vector<8x192xf32>
    %103 = math.exp %102 : vector<8x192xf32>
    %cst_30 = arith.constant 1.000000e+00 : f32
    %104 = vector.broadcast %cst_30 : f32 to vector<8x192xf32>
    %105 = arith.addf %104, %103 : vector<8x192xf32>
    %106 = arith.divf %104, %105 : vector<8x192xf32>
    %107 = vector.extract_strided_slice %100 {offsets = [0, 192], sizes = [8, 64], strides = [1, 1]} : vector<8x256xf32> to vector<8x64xf32>
    %108 = math.tanh %107 : vector<8x64xf32>
    %109 = vector.extract_strided_slice %106 {offsets = [0, 0], sizes = [8, 64], strides = [1, 1]} : vector<8x192xf32> to vector<8x64xf32>
    %110 = vector.extract_strided_slice %106 {offsets = [0, 64], sizes = [8, 64], strides = [1, 1]} : vector<8x192xf32> to vector<8x64xf32>
    %111 = vector.extract_strided_slice %106 {offsets = [0, 128], sizes = [8, 64], strides = [1, 1]} : vector<8x192xf32> to vector<8x64xf32>
    %112 = arith.mulf %110, %74 : vector<8x64xf32>
    %113 = arith.mulf %109, %108 : vector<8x64xf32>
    %114 = arith.addf %112, %113 : vector<8x64xf32>
    %115 = math.tanh %114 : vector<8x64xf32>
    %116 = arith.mulf %111, %115 : vector<8x64xf32>
    %117 = tpu.concatenate %116, %95 in 1 : vector<8x64xf32>, vector<8x64xf32> -> vector<8x128xf32>
    %cst_31 = arith.constant dense<0.000000e+00> : vector<8x256xf32>
    %118 = tpu.matmul %117, %4, %cst_31 {dimension_numbers = #tpu.dot_dimension_numbers<[1], [0], [0], [1], [0, 0, 1, 1], [], []>} : vector<8x128xf32>, vector<128x256xf32>, vector<8x256xf32> -> vector<8x256xf32>
    %119 = arith.addf %118, %7 : vector<8x256xf32>
    %120 = vector.extract_strided_slice %119 {offsets = [0, 0], sizes = [8, 192], strides = [1, 1]} : vector<8x256xf32> to vector<8x192xf32>
    %121 = arith.negf %120 : vector<8x192xf32>
    %122 = math.exp %121 : vector<8x192xf32>
    %cst_32 = arith.constant 1.000000e+00 : f32
    %123 = vector.broadcast %cst_32 : f32 to vector<8x192xf32>
    %124 = arith.addf %123, %122 : vector<8x192xf32>
    %125 = arith.divf %123, %124 : vector<8x192xf32>
    %126 = vector.extract_strided_slice %119 {offsets = [0, 192], sizes = [8, 64], strides = [1, 1]} : vector<8x256xf32> to vector<8x64xf32>
    %127 = math.tanh %126 : vector<8x64xf32>
    %128 = vector.extract_strided_slice %125 {offsets = [0, 0], sizes = [8, 64], strides = [1, 1]} : vector<8x192xf32> to vector<8x64xf32>
    %129 = vector.extract_strided_slice %125 {offsets = [0, 64], sizes = [8, 64], strides = [1, 1]} : vector<8x192xf32> to vector<8x64xf32>
    %130 = vector.extract_strided_slice %125 {offsets = [0, 128], sizes = [8, 64], strides = [1, 1]} : vector<8x192xf32> to vector<8x64xf32>
    %131 = arith.mulf %129, %93 : vector<8x64xf32>
    %132 = arith.mulf %128, %127 : vector<8x64xf32>
    %133 = arith.addf %131, %132 : vector<8x64xf32>
    %134 = math.tanh %133 : vector<8x64xf32>
    %135 = arith.mulf %130, %134 : vector<8x64xf32>
    %c3_i32 = arith.constant 3 : i32
    %136 = arith.index_cast %c3_i32 : i32 to index
    %c0_33 = arith.constant 0 : index
    %c0_34 = arith.constant 0 : index
    %137 = vector.load %arg1[%136, %c0_33, %c0_34] : memref<8x8x256xf32, #tpu.memory_space<vmem>>, vector<1x8x256xf32>
    %138 = vector.shape_cast %137 : vector<1x8x256xf32> to vector<8x256xf32>
    %cst_35 = arith.constant dense<0.000000e+00> : vector<8x256xf32>
    %139 = tpu.matmul %116, %3, %cst_35 {dimension_numbers = #tpu.dot_dimension_numbers<[1], [0], [0], [1], [0, 0, 1, 1], [], []>} : vector<8x64xf32>, vector<64x256xf32>, vector<8x256xf32> -> vector<8x256xf32>
    %140 = arith.addf %138, %139 : vector<8x256xf32>
    %141 = vector.extract_strided_slice %140 {offsets = [0, 0], sizes = [8, 192], strides = [1, 1]} : vector<8x256xf32> to vector<8x192xf32>
    %142 = arith.negf %141 : vector<8x192xf32>
    %143 = math.exp %142 : vector<8x192xf32>
    %cst_36 = arith.constant 1.000000e+00 : f32
    %144 = vector.broadcast %cst_36 : f32 to vector<8x192xf32>
    %145 = arith.addf %144, %143 : vector<8x192xf32>
    %146 = arith.divf %144, %145 : vector<8x192xf32>
    %147 = vector.extract_strided_slice %140 {offsets = [0, 192], sizes = [8, 64], strides = [1, 1]} : vector<8x256xf32> to vector<8x64xf32>
    %148 = math.tanh %147 : vector<8x64xf32>
    %149 = vector.extract_strided_slice %146 {offsets = [0, 0], sizes = [8, 64], strides = [1, 1]} : vector<8x192xf32> to vector<8x64xf32>
    %150 = vector.extract_strided_slice %146 {offsets = [0, 64], sizes = [8, 64], strides = [1, 1]} : vector<8x192xf32> to vector<8x64xf32>
    %151 = vector.extract_strided_slice %146 {offsets = [0, 128], sizes = [8, 64], strides = [1, 1]} : vector<8x192xf32> to vector<8x64xf32>
    %152 = arith.mulf %150, %114 : vector<8x64xf32>
    %153 = arith.mulf %149, %148 : vector<8x64xf32>
    %154 = arith.addf %152, %153 : vector<8x64xf32>
    %155 = math.tanh %154 : vector<8x64xf32>
    %156 = arith.mulf %151, %155 : vector<8x64xf32>
    %157 = tpu.concatenate %156, %135 in 1 : vector<8x64xf32>, vector<8x64xf32> -> vector<8x128xf32>
    %cst_37 = arith.constant dense<0.000000e+00> : vector<8x256xf32>
    %158 = tpu.matmul %157, %4, %cst_37 {dimension_numbers = #tpu.dot_dimension_numbers<[1], [0], [0], [1], [0, 0, 1, 1], [], []>} : vector<8x128xf32>, vector<128x256xf32>, vector<8x256xf32> -> vector<8x256xf32>
    %159 = arith.addf %158, %7 : vector<8x256xf32>
    %160 = vector.extract_strided_slice %159 {offsets = [0, 0], sizes = [8, 192], strides = [1, 1]} : vector<8x256xf32> to vector<8x192xf32>
    %161 = arith.negf %160 : vector<8x192xf32>
    %162 = math.exp %161 : vector<8x192xf32>
    %cst_38 = arith.constant 1.000000e+00 : f32
    %163 = vector.broadcast %cst_38 : f32 to vector<8x192xf32>
    %164 = arith.addf %163, %162 : vector<8x192xf32>
    %165 = arith.divf %163, %164 : vector<8x192xf32>
    %166 = vector.extract_strided_slice %159 {offsets = [0, 192], sizes = [8, 64], strides = [1, 1]} : vector<8x256xf32> to vector<8x64xf32>
    %167 = math.tanh %166 : vector<8x64xf32>
    %168 = vector.extract_strided_slice %165 {offsets = [0, 0], sizes = [8, 64], strides = [1, 1]} : vector<8x192xf32> to vector<8x64xf32>
    %169 = vector.extract_strided_slice %165 {offsets = [0, 64], sizes = [8, 64], strides = [1, 1]} : vector<8x192xf32> to vector<8x64xf32>
    %170 = vector.extract_strided_slice %165 {offsets = [0, 128], sizes = [8, 64], strides = [1, 1]} : vector<8x192xf32> to vector<8x64xf32>
    %171 = arith.mulf %169, %133 : vector<8x64xf32>
    %172 = arith.mulf %168, %167 : vector<8x64xf32>
    %173 = arith.addf %171, %172 : vector<8x64xf32>
    %174 = math.tanh %173 : vector<8x64xf32>
    %175 = arith.mulf %170, %174 : vector<8x64xf32>
    %c4_i32 = arith.constant 4 : i32
    %176 = arith.index_cast %c4_i32 : i32 to index
    %c0_39 = arith.constant 0 : index
    %c0_40 = arith.constant 0 : index
    %177 = vector.load %arg1[%176, %c0_39, %c0_40] : memref<8x8x256xf32, #tpu.memory_space<vmem>>, vector<1x8x256xf32>
    %178 = vector.shape_cast %177 : vector<1x8x256xf32> to vector<8x256xf32>
    %cst_41 = arith.constant dense<0.000000e+00> : vector<8x256xf32>
    %179 = tpu.matmul %156, %3, %cst_41 {dimension_numbers = #tpu.dot_dimension_numbers<[1], [0], [0], [1], [0, 0, 1, 1], [], []>} : vector<8x64xf32>, vector<64x256xf32>, vector<8x256xf32> -> vector<8x256xf32>
    %180 = arith.addf %178, %179 : vector<8x256xf32>
    %181 = vector.extract_strided_slice %180 {offsets = [0, 0], sizes = [8, 192], strides = [1, 1]} : vector<8x256xf32> to vector<8x192xf32>
    %182 = arith.negf %181 : vector<8x192xf32>
    %183 = math.exp %182 : vector<8x192xf32>
    %cst_42 = arith.constant 1.000000e+00 : f32
    %184 = vector.broadcast %cst_42 : f32 to vector<8x192xf32>
    %185 = arith.addf %184, %183 : vector<8x192xf32>
    %186 = arith.divf %184, %185 : vector<8x192xf32>
    %187 = vector.extract_strided_slice %180 {offsets = [0, 192], sizes = [8, 64], strides = [1, 1]} : vector<8x256xf32> to vector<8x64xf32>
    %188 = math.tanh %187 : vector<8x64xf32>
    %189 = vector.extract_strided_slice %186 {offsets = [0, 0], sizes = [8, 64], strides = [1, 1]} : vector<8x192xf32> to vector<8x64xf32>
    %190 = vector.extract_strided_slice %186 {offsets = [0, 64], sizes = [8, 64], strides = [1, 1]} : vector<8x192xf32> to vector<8x64xf32>
    %191 = vector.extract_strided_slice %186 {offsets = [0, 128], sizes = [8, 64], strides = [1, 1]} : vector<8x192xf32> to vector<8x64xf32>
    %192 = arith.mulf %190, %154 : vector<8x64xf32>
    %193 = arith.mulf %189, %188 : vector<8x64xf32>
    %194 = arith.addf %192, %193 : vector<8x64xf32>
    %195 = math.tanh %194 : vector<8x64xf32>
    %196 = arith.mulf %191, %195 : vector<8x64xf32>
    %197 = tpu.concatenate %196, %175 in 1 : vector<8x64xf32>, vector<8x64xf32> -> vector<8x128xf32>
    %cst_43 = arith.constant dense<0.000000e+00> : vector<8x256xf32>
    %198 = tpu.matmul %197, %4, %cst_43 {dimension_numbers = #tpu.dot_dimension_numbers<[1], [0], [0], [1], [0, 0, 1, 1], [], []>} : vector<8x128xf32>, vector<128x256xf32>, vector<8x256xf32> -> vector<8x256xf32>
    %199 = arith.addf %198, %7 : vector<8x256xf32>
    %200 = vector.extract_strided_slice %199 {offsets = [0, 0], sizes = [8, 192], strides = [1, 1]} : vector<8x256xf32> to vector<8x192xf32>
    %201 = arith.negf %200 : vector<8x192xf32>
    %202 = math.exp %201 : vector<8x192xf32>
    %cst_44 = arith.constant 1.000000e+00 : f32
    %203 = vector.broadcast %cst_44 : f32 to vector<8x192xf32>
    %204 = arith.addf %203, %202 : vector<8x192xf32>
    %205 = arith.divf %203, %204 : vector<8x192xf32>
    %206 = vector.extract_strided_slice %199 {offsets = [0, 192], sizes = [8, 64], strides = [1, 1]} : vector<8x256xf32> to vector<8x64xf32>
    %207 = math.tanh %206 : vector<8x64xf32>
    %208 = vector.extract_strided_slice %205 {offsets = [0, 0], sizes = [8, 64], strides = [1, 1]} : vector<8x192xf32> to vector<8x64xf32>
    %209 = vector.extract_strided_slice %205 {offsets = [0, 64], sizes = [8, 64], strides = [1, 1]} : vector<8x192xf32> to vector<8x64xf32>
    %210 = vector.extract_strided_slice %205 {offsets = [0, 128], sizes = [8, 64], strides = [1, 1]} : vector<8x192xf32> to vector<8x64xf32>
    %211 = arith.mulf %209, %173 : vector<8x64xf32>
    %212 = arith.mulf %208, %207 : vector<8x64xf32>
    %213 = arith.addf %211, %212 : vector<8x64xf32>
    %214 = math.tanh %213 : vector<8x64xf32>
    %215 = arith.mulf %210, %214 : vector<8x64xf32>
    %c5_i32 = arith.constant 5 : i32
    %216 = arith.index_cast %c5_i32 : i32 to index
    %c0_45 = arith.constant 0 : index
    %c0_46 = arith.constant 0 : index
    %217 = vector.load %arg1[%216, %c0_45, %c0_46] : memref<8x8x256xf32, #tpu.memory_space<vmem>>, vector<1x8x256xf32>
    %218 = vector.shape_cast %217 : vector<1x8x256xf32> to vector<8x256xf32>
    %cst_47 = arith.constant dense<0.000000e+00> : vector<8x256xf32>
    %219 = tpu.matmul %196, %3, %cst_47 {dimension_numbers = #tpu.dot_dimension_numbers<[1], [0], [0], [1], [0, 0, 1, 1], [], []>} : vector<8x64xf32>, vector<64x256xf32>, vector<8x256xf32> -> vector<8x256xf32>
    %220 = arith.addf %218, %219 : vector<8x256xf32>
    %221 = vector.extract_strided_slice %220 {offsets = [0, 0], sizes = [8, 192], strides = [1, 1]} : vector<8x256xf32> to vector<8x192xf32>
    %222 = arith.negf %221 : vector<8x192xf32>
    %223 = math.exp %222 : vector<8x192xf32>
    %cst_48 = arith.constant 1.000000e+00 : f32
    %224 = vector.broadcast %cst_48 : f32 to vector<8x192xf32>
    %225 = arith.addf %224, %223 : vector<8x192xf32>
    %226 = arith.divf %224, %225 : vector<8x192xf32>
    %227 = vector.extract_strided_slice %220 {offsets = [0, 192], sizes = [8, 64], strides = [1, 1]} : vector<8x256xf32> to vector<8x64xf32>
    %228 = math.tanh %227 : vector<8x64xf32>
    %229 = vector.extract_strided_slice %226 {offsets = [0, 0], sizes = [8, 64], strides = [1, 1]} : vector<8x192xf32> to vector<8x64xf32>
    %230 = vector.extract_strided_slice %226 {offsets = [0, 64], sizes = [8, 64], strides = [1, 1]} : vector<8x192xf32> to vector<8x64xf32>
    %231 = vector.extract_strided_slice %226 {offsets = [0, 128], sizes = [8, 64], strides = [1, 1]} : vector<8x192xf32> to vector<8x64xf32>
    %232 = arith.mulf %230, %194 : vector<8x64xf32>
    %233 = arith.mulf %229, %228 : vector<8x64xf32>
    %234 = arith.addf %232, %233 : vector<8x64xf32>
    %235 = math.tanh %234 : vector<8x64xf32>
    %236 = arith.mulf %231, %235 : vector<8x64xf32>
    %237 = tpu.concatenate %236, %215 in 1 : vector<8x64xf32>, vector<8x64xf32> -> vector<8x128xf32>
    %cst_49 = arith.constant dense<0.000000e+00> : vector<8x256xf32>
    %238 = tpu.matmul %237, %4, %cst_49 {dimension_numbers = #tpu.dot_dimension_numbers<[1], [0], [0], [1], [0, 0, 1, 1], [], []>} : vector<8x128xf32>, vector<128x256xf32>, vector<8x256xf32> -> vector<8x256xf32>
    %239 = arith.addf %238, %7 : vector<8x256xf32>
    %240 = vector.extract_strided_slice %239 {offsets = [0, 0], sizes = [8, 192], strides = [1, 1]} : vector<8x256xf32> to vector<8x192xf32>
    %241 = arith.negf %240 : vector<8x192xf32>
    %242 = math.exp %241 : vector<8x192xf32>
    %cst_50 = arith.constant 1.000000e+00 : f32
    %243 = vector.broadcast %cst_50 : f32 to vector<8x192xf32>
    %244 = arith.addf %243, %242 : vector<8x192xf32>
    %245 = arith.divf %243, %244 : vector<8x192xf32>
    %246 = vector.extract_strided_slice %239 {offsets = [0, 192], sizes = [8, 64], strides = [1, 1]} : vector<8x256xf32> to vector<8x64xf32>
    %247 = math.tanh %246 : vector<8x64xf32>
    %248 = vector.extract_strided_slice %245 {offsets = [0, 0], sizes = [8, 64], strides = [1, 1]} : vector<8x192xf32> to vector<8x64xf32>
    %249 = vector.extract_strided_slice %245 {offsets = [0, 64], sizes = [8, 64], strides = [1, 1]} : vector<8x192xf32> to vector<8x64xf32>
    %250 = vector.extract_strided_slice %245 {offsets = [0, 128], sizes = [8, 64], strides = [1, 1]} : vector<8x192xf32> to vector<8x64xf32>
    %251 = arith.mulf %249, %213 : vector<8x64xf32>
    %252 = arith.mulf %248, %247 : vector<8x64xf32>
    %253 = arith.addf %251, %252 : vector<8x64xf32>
    %254 = math.tanh %253 : vector<8x64xf32>
    %255 = arith.mulf %250, %254 : vector<8x64xf32>
    %c6_i32 = arith.constant 6 : i32
    %256 = arith.index_cast %c6_i32 : i32 to index
    %c0_51 = arith.constant 0 : index
    %c0_52 = arith.constant 0 : index
    %257 = vector.load %arg1[%256, %c0_51, %c0_52] : memref<8x8x256xf32, #tpu.memory_space<vmem>>, vector<1x8x256xf32>
    %258 = vector.shape_cast %257 : vector<1x8x256xf32> to vector<8x256xf32>
    %cst_53 = arith.constant dense<0.000000e+00> : vector<8x256xf32>
    %259 = tpu.matmul %236, %3, %cst_53 {dimension_numbers = #tpu.dot_dimension_numbers<[1], [0], [0], [1], [0, 0, 1, 1], [], []>} : vector<8x64xf32>, vector<64x256xf32>, vector<8x256xf32> -> vector<8x256xf32>
    %260 = arith.addf %258, %259 : vector<8x256xf32>
    %261 = vector.extract_strided_slice %260 {offsets = [0, 0], sizes = [8, 192], strides = [1, 1]} : vector<8x256xf32> to vector<8x192xf32>
    %262 = arith.negf %261 : vector<8x192xf32>
    %263 = math.exp %262 : vector<8x192xf32>
    %cst_54 = arith.constant 1.000000e+00 : f32
    %264 = vector.broadcast %cst_54 : f32 to vector<8x192xf32>
    %265 = arith.addf %264, %263 : vector<8x192xf32>
    %266 = arith.divf %264, %265 : vector<8x192xf32>
    %267 = vector.extract_strided_slice %260 {offsets = [0, 192], sizes = [8, 64], strides = [1, 1]} : vector<8x256xf32> to vector<8x64xf32>
    %268 = math.tanh %267 : vector<8x64xf32>
    %269 = vector.extract_strided_slice %266 {offsets = [0, 0], sizes = [8, 64], strides = [1, 1]} : vector<8x192xf32> to vector<8x64xf32>
    %270 = vector.extract_strided_slice %266 {offsets = [0, 64], sizes = [8, 64], strides = [1, 1]} : vector<8x192xf32> to vector<8x64xf32>
    %271 = vector.extract_strided_slice %266 {offsets = [0, 128], sizes = [8, 64], strides = [1, 1]} : vector<8x192xf32> to vector<8x64xf32>
    %272 = arith.mulf %270, %234 : vector<8x64xf32>
    %273 = arith.mulf %269, %268 : vector<8x64xf32>
    %274 = arith.addf %272, %273 : vector<8x64xf32>
    %275 = math.tanh %274 : vector<8x64xf32>
    %276 = arith.mulf %271, %275 : vector<8x64xf32>
    %277 = tpu.concatenate %276, %255 in 1 : vector<8x64xf32>, vector<8x64xf32> -> vector<8x128xf32>
    %cst_55 = arith.constant dense<0.000000e+00> : vector<8x256xf32>
    %278 = tpu.matmul %277, %4, %cst_55 {dimension_numbers = #tpu.dot_dimension_numbers<[1], [0], [0], [1], [0, 0, 1, 1], [], []>} : vector<8x128xf32>, vector<128x256xf32>, vector<8x256xf32> -> vector<8x256xf32>
    %279 = arith.addf %278, %7 : vector<8x256xf32>
    %280 = vector.extract_strided_slice %279 {offsets = [0, 0], sizes = [8, 192], strides = [1, 1]} : vector<8x256xf32> to vector<8x192xf32>
    %281 = arith.negf %280 : vector<8x192xf32>
    %282 = math.exp %281 : vector<8x192xf32>
    %cst_56 = arith.constant 1.000000e+00 : f32
    %283 = vector.broadcast %cst_56 : f32 to vector<8x192xf32>
    %284 = arith.addf %283, %282 : vector<8x192xf32>
    %285 = arith.divf %283, %284 : vector<8x192xf32>
    %286 = vector.extract_strided_slice %279 {offsets = [0, 192], sizes = [8, 64], strides = [1, 1]} : vector<8x256xf32> to vector<8x64xf32>
    %287 = math.tanh %286 : vector<8x64xf32>
    %288 = vector.extract_strided_slice %285 {offsets = [0, 0], sizes = [8, 64], strides = [1, 1]} : vector<8x192xf32> to vector<8x64xf32>
    %289 = vector.extract_strided_slice %285 {offsets = [0, 64], sizes = [8, 64], strides = [1, 1]} : vector<8x192xf32> to vector<8x64xf32>
    %290 = vector.extract_strided_slice %285 {offsets = [0, 128], sizes = [8, 64], strides = [1, 1]} : vector<8x192xf32> to vector<8x64xf32>
    %291 = arith.mulf %289, %253 : vector<8x64xf32>
    %292 = arith.mulf %288, %287 : vector<8x64xf32>
    %293 = arith.addf %291, %292 : vector<8x64xf32>
    %294 = math.tanh %293 : vector<8x64xf32>
    %295 = arith.mulf %290, %294 : vector<8x64xf32>
    %c7_i32 = arith.constant 7 : i32
    %296 = arith.index_cast %c7_i32 : i32 to index
    %c0_57 = arith.constant 0 : index
    %c0_58 = arith.constant 0 : index
    %297 = vector.load %arg1[%296, %c0_57, %c0_58] : memref<8x8x256xf32, #tpu.memory_space<vmem>>, vector<1x8x256xf32>
    %298 = vector.shape_cast %297 : vector<1x8x256xf32> to vector<8x256xf32>
    %cst_59 = arith.constant dense<0.000000e+00> : vector<8x256xf32>
    %299 = tpu.matmul %276, %3, %cst_59 {dimension_numbers = #tpu.dot_dimension_numbers<[1], [0], [0], [1], [0, 0, 1, 1], [], []>} : vector<8x64xf32>, vector<64x256xf32>, vector<8x256xf32> -> vector<8x256xf32>
    %300 = arith.addf %298, %299 : vector<8x256xf32>
    %301 = vector.extract_strided_slice %300 {offsets = [0, 0], sizes = [8, 192], strides = [1, 1]} : vector<8x256xf32> to vector<8x192xf32>
    %302 = arith.negf %301 : vector<8x192xf32>
    %303 = math.exp %302 : vector<8x192xf32>
    %cst_60 = arith.constant 1.000000e+00 : f32
    %304 = vector.broadcast %cst_60 : f32 to vector<8x192xf32>
    %305 = arith.addf %304, %303 : vector<8x192xf32>
    %306 = arith.divf %304, %305 : vector<8x192xf32>
    %307 = vector.extract_strided_slice %300 {offsets = [0, 192], sizes = [8, 64], strides = [1, 1]} : vector<8x256xf32> to vector<8x64xf32>
    %308 = math.tanh %307 : vector<8x64xf32>
    %309 = vector.extract_strided_slice %306 {offsets = [0, 0], sizes = [8, 64], strides = [1, 1]} : vector<8x192xf32> to vector<8x64xf32>
    %310 = vector.extract_strided_slice %306 {offsets = [0, 64], sizes = [8, 64], strides = [1, 1]} : vector<8x192xf32> to vector<8x64xf32>
    %311 = vector.extract_strided_slice %306 {offsets = [0, 128], sizes = [8, 64], strides = [1, 1]} : vector<8x192xf32> to vector<8x64xf32>
    %312 = arith.mulf %310, %274 : vector<8x64xf32>
    %313 = arith.mulf %309, %308 : vector<8x64xf32>
    %314 = arith.addf %312, %313 : vector<8x64xf32>
    %315 = math.tanh %314 : vector<8x64xf32>
    %316 = arith.mulf %311, %315 : vector<8x64xf32>
    %317 = tpu.concatenate %316, %295 in 1 : vector<8x64xf32>, vector<8x64xf32> -> vector<8x128xf32>
    %cst_61 = arith.constant dense<0.000000e+00> : vector<8x256xf32>
    %318 = tpu.matmul %317, %4, %cst_61 {dimension_numbers = #tpu.dot_dimension_numbers<[1], [0], [0], [1], [0, 0, 1, 1], [], []>} : vector<8x128xf32>, vector<128x256xf32>, vector<8x256xf32> -> vector<8x256xf32>
    %319 = arith.addf %318, %7 : vector<8x256xf32>
    %320 = vector.extract_strided_slice %319 {offsets = [0, 0], sizes = [8, 192], strides = [1, 1]} : vector<8x256xf32> to vector<8x192xf32>
    %321 = arith.negf %320 : vector<8x192xf32>
    %322 = math.exp %321 : vector<8x192xf32>
    %cst_62 = arith.constant 1.000000e+00 : f32
    %323 = vector.broadcast %cst_62 : f32 to vector<8x192xf32>
    %324 = arith.addf %323, %322 : vector<8x192xf32>
    %325 = arith.divf %323, %324 : vector<8x192xf32>
    %326 = vector.extract_strided_slice %319 {offsets = [0, 192], sizes = [8, 64], strides = [1, 1]} : vector<8x256xf32> to vector<8x64xf32>
    %327 = math.tanh %326 : vector<8x64xf32>
    %328 = vector.extract_strided_slice %325 {offsets = [0, 0], sizes = [8, 64], strides = [1, 1]} : vector<8x192xf32> to vector<8x64xf32>
    %329 = vector.extract_strided_slice %325 {offsets = [0, 64], sizes = [8, 64], strides = [1, 1]} : vector<8x192xf32> to vector<8x64xf32>
    %330 = vector.extract_strided_slice %325 {offsets = [0, 128], sizes = [8, 64], strides = [1, 1]} : vector<8x192xf32> to vector<8x64xf32>
    %331 = arith.mulf %329, %293 : vector<8x64xf32>
    %332 = arith.mulf %328, %327 : vector<8x64xf32>
    %333 = arith.addf %331, %332 : vector<8x64xf32>
    %334 = math.tanh %333 : vector<8x64xf32>
    %335 = arith.mulf %330, %334 : vector<8x64xf32>
    %c8_i32 = arith.constant 8 : i32
    %c0_63 = arith.constant 0 : index
    %c0_64 = arith.constant 0 : index
    %c0_65 = arith.constant 0 : index
    %336 = vector.load %arg8[%c0_63, %c0_64, %c0_65] : memref<4x8x64xf32, #tpu.memory_space<vmem>>, vector<1x8x64xf32>
    %337 = vector.shape_cast %336 : vector<1x8x64xf32> to vector<8x64xf32>
    %338 = vector.shape_cast %316 : vector<8x64xf32> to vector<1x8x64xf32>
    tpu.vector_store %arg8[%c0_63, %c0_64, %c0_65], %338 {strides = array<i32>} : memref<4x8x64xf32, #tpu.memory_space<vmem>>, vector<1x8x64xf32>,
    %c1_66 = arith.constant 1 : index
    %c0_67 = arith.constant 0 : index
    %c0_68 = arith.constant 0 : index
    %339 = vector.load %arg8[%c1_66, %c0_67, %c0_68] : memref<4x8x64xf32, #tpu.memory_space<vmem>>, vector<1x8x64xf32>
    %340 = vector.shape_cast %339 : vector<1x8x64xf32> to vector<8x64xf32>
    %341 = vector.shape_cast %314 : vector<8x64xf32> to vector<1x8x64xf32>
    tpu.vector_store %arg8[%c1_66, %c0_67, %c0_68], %341 {strides = array<i32>} : memref<4x8x64xf32, #tpu.memory_space<vmem>>, vector<1x8x64xf32>,
    %c2_69 = arith.constant 2 : index
    %c0_70 = arith.constant 0 : index
    %c0_71 = arith.constant 0 : index
    %342 = vector.load %arg8[%c2_69, %c0_70, %c0_71] : memref<4x8x64xf32, #tpu.memory_space<vmem>>, vector<1x8x64xf32>
    %343 = vector.shape_cast %342 : vector<1x8x64xf32> to vector<8x64xf32>
    %344 = vector.shape_cast %335 : vector<8x64xf32> to vector<1x8x64xf32>
    tpu.vector_store %arg8[%c2_69, %c0_70, %c0_71], %344 {strides = array<i32>} : memref<4x8x64xf32, #tpu.memory_space<vmem>>, vector<1x8x64xf32>,
    %c3_72 = arith.constant 3 : index
    %c0_73 = arith.constant 0 : index
    %c0_74 = arith.constant 0 : index
    %345 = vector.load %arg8[%c3_72, %c0_73, %c0_74] : memref<4x8x64xf32, #tpu.memory_space<vmem>>, vector<1x8x64xf32>
    %346 = vector.shape_cast %345 : vector<1x8x64xf32> to vector<8x64xf32>
    %347 = vector.shape_cast %333 : vector<8x64xf32> to vector<1x8x64xf32>
    tpu.vector_store %arg8[%c3_72, %c0_73, %c0_74], %347 {strides = array<i32>} : memref<4x8x64xf32, #tpu.memory_space<vmem>>, vector<1x8x64xf32>,
    %c0_i32_75 = arith.constant 0 : i32
    %348 = arith.cmpi eq, %arg0, %c0_i32_75 : i32
    %349 = arith.extui %348 : i1 to i32
    %c0_i32_76 = arith.constant 0 : i32
    %350 = arith.cmpi ne, %349, %c0_i32_76 : i32
    scf.if %350 {
      %c0_77 = arith.constant 0 : index
      %c0_78 = arith.constant 0 : index
      %351 = vector.load %arg5[%c0_77, %c0_78] : memref<64x256xf32, #tpu.memory_space<vmem>>, vector<64x256xf32>
      %cst_79 = arith.constant dense<0.000000e+00> : vector<8x256xf32>
      %352 = tpu.matmul %335, %351, %cst_79 {dimension_numbers = #tpu.dot_dimension_numbers<[1], [0], [0], [1], [0, 0, 1, 1], [], []>} : vector<8x64xf32>, vector<64x256xf32>, vector<8x256xf32> -> vector<8x256xf32>
      %c0_80 = arith.constant 0 : index
      %c0_81 = arith.constant 0 : index
      %353 = vector.load %arg6[%c0_80, %c0_81] : memref<1x256xf32, #tpu.memory_space<vmem>>, vector<1x256xf32>
      %354 = vector.broadcast %353 : vector<1x256xf32> to vector<8x256xf32>
      %355 = arith.addf %352, %354 : vector<8x256xf32>
      %c0_82 = arith.constant 0 : index
      %c0_83 = arith.constant 0 : index
      %356 = vector.load %arg7[%c0_82, %c0_83] : memref<8x256xf32, #tpu.memory_space<vmem>>, vector<8x256xf32>
      tpu.vector_store %arg7[%c0_82, %c0_83], %355 {strides = array<i32>} : memref<8x256xf32, #tpu.memory_space<vmem>>, vector<8x256xf32>,
    } else {
    }
    return
  }
  func.func @transform_0(%arg0: i32) -> (i32, i32, i32) {
    %c0_i32 = arith.constant 0 : i32
    %c0_i32_0 = arith.constant 0 : i32
    %c0_i32_1 = arith.constant 0 : i32
    return %arg0, %c0_i32, %c0_i32_0 : i32, i32, i32
  }
  func.func @transform_1(%arg0: i32) -> (i32, i32) {
    %c0_i32 = arith.constant 0 : i32
    %c0_i32_0 = arith.constant 0 : i32
    %c0_i32_1 = arith.constant 0 : i32
    return %c0_i32, %c0_i32_0 : i32, i32
  }
  func.func @transform_2(%arg0: i32) -> (i32, i32) {
    %c0_i32 = arith.constant 0 : i32
    %c0_i32_0 = arith.constant 0 : i32
    %c0_i32_1 = arith.constant 0 : i32
    return %c0_i32, %c0_i32_0 : i32, i32
  }
  func.func @transform_3(%arg0: i32) -> (i32, i32) {
    %c0_i32 = arith.constant 0 : i32
    %c0_i32_0 = arith.constant 0 : i32
    %c0_i32_1 = arith.constant 0 : i32
    return %c0_i32, %c0_i32_0 : i32, i32
  }
  func.func @transform_4(%arg0: i32) -> (i32, i32) {
    %c0_i32 = arith.constant 0 : i32
    %c0_i32_0 = arith.constant 0 : i32
    %c0_i32_1 = arith.constant 0 : i32
    return %c0_i32, %c0_i32_0 : i32, i32
  }
  func.func @transform_5(%arg0: i32) -> (i32, i32) {
    %c0_i32 = arith.constant 0 : i32
    %c0_i32_0 = arith.constant 0 : i32
    %c0_i32_1 = arith.constant 0 : i32
    return %c0_i32, %c0_i32_0 : i32, i32
  }
  func.func @transform_6(%arg0: i32) -> (i32, i32) {
    %c0_i32 = arith.constant 0 : i32
    %c0_i32_0 = arith.constant 0 : i32
    %c0_i32_1 = arith.constant 0 : i32
    return %c0_i32, %c0_i32_0 : i32, i32
  }
}

</mosaic_0001>

<bundles_post_ra>
// kernel: lstm_model_forward.2
= control target key start
LH: loop header
LB: loop body
LE: loop exit
PB: predicated region body
PF: predicated region fallthrough
CT: control target
= control target key end

     0   :  { %8 = vsyncpa [#allocation3], 0  ;;  %s343_s12 = smov [#allocation2]   ;;  %s468_s0 = inlined_call_operand.vmem [shape: f32[64,256], index: 0, kind: input, shape index: {}]   ;;  %s469_s1 = inlined_call_operand.hbm [shape: f32[256,256], index: 1, kind: input, shape index: {}]   ;;  %s470_s2 = inlined_call_operand.vmem [shape: f32[1,256], index: 2, kind: input, shape index: {}]   ;;  %s471_s3 = inlined_call_operand.vmem [shape: f32[64,256], index: 3, kind: output, shape index: {}]  }
   0x1   :  { %s16_s13 = sshll.u32 %s343_s12, 4  ;;  %s17_s13 = int_to_ptr.vmem [resolvable:$true] %s16_s13 }
   0x2   :  { %s329_s14 = scalar_lea.vmem %s17_s13, 8192  ;;  %p334_p1 = scmp.lt.s32.totalorder %s17_s13, %s17_s13 }
   0x3   :  { %p330_p0 = scmp.ne.s32.totalorder %s17_s13, %s329_s14  ;;  %p335_p2 = scmp.lt.s32.totalorder %s329_s14, %s329_s14 }
   0x5   :  { %p336_p3 = por %p335_p2, %p334_p1 }
   0x7   :  { %p337_p4 = pnand %p336_p3, %p330_p0 }
   0x9   :  { %340 = shalt.err (!%p337_p4)
}
   0xa   :  { %s344_s15 = smov 256   ;;  %s345_s16 = smov 16  }
   0xb   :  { %22 = dma.hbm_to_vmem [thread:$0]  %s469_s1, 8192, %s17_s13, [#allocation3], %s344_s15, %s344_s15, %s345_s16  }
   0xc   :  { %341 = dma.done.wait [#allocation3], 8192  }
   0xd   :  { %342 = vsyncadd [#allocation3], 4294959104  ;;  %v75_v0 = vld [vmem:[#allocation2 + $0xf8] sm:$0xff]  ;;  %v74_v1 = vld [vmem:[#allocation2 + $0xf0] sm:$0xff] }
   0xe   :  { %v73_v2 = vld [vmem:[#allocation2 + $0xe8] sm:$0xff]  ;;  %120 = vmatprep.subr.mxu0 %v75_v0  ;;  %254 = vmatprep.subr.mxu1 %v75_v0  ;;  %v72_v3 = vld [vmem:[#allocation2 + $0xe0] sm:$0xff]  ;;  %v71_v4 = vld [vmem:[#allocation2 + $0xd8] sm:$0xff] }
   0xf   :  { %121 = vmatpush1.msra.mxu0 %v74_v1  ;;  %286 = vmatpush1.msra.mxu1 %v74_v1  ;;  %v70_v5 = vld [vmem:[#allocation2 + $0xd0] sm:$0xff]  ;;  %v69_v6 = vld [vmem:[#allocation2 + $0xc8] sm:$0xff]  ;;  %v68_v7 = vld [vmem:[#allocation2 + $0xc0] sm:$0xff] }
  0x10   :  { %122 = vmatprep.subr.mxu0 %v73_v2  ;;  %255 = vmatprep.subr.mxu1 %v73_v2  ;;  %v67_v8 = vld [vmem:[#allocation2 + $0xb8] sm:$0xff]  ;;  %v66_v9 = vld [vmem:[#allocation2 + $0xb0] sm:$0xff]  ;;  %v65_v10 = vld [vmem:[#allocation2 + $0xa8] sm:$0xff] }
  0x11   :  { %123 = vmatpush1.msra.mxu0 %v72_v3  ;;  %287 = vmatpush1.msra.mxu1 %v72_v3  ;;  %v64_v11 = vld [vmem:[#allocation2 + $0xa0] sm:$0xff]  ;;  %v63_v12 = vld [vmem:[#allocation2 + $0x98] sm:$0xff]  ;;  %v62_v13 = vld [vmem:[#allocation2 + $0x90] sm:$0xff] }
  0x12   :  { %124 = vmatprep.subr.mxu0 %v71_v4  ;;  %256 = vmatprep.subr.mxu1 %v71_v4  ;;  %v61_v14 = vld [vmem:[#allocation2 + $0x88] sm:$0xff]  ;;  %v60_v15 = vld [vmem:[#allocation2 + $0x80] sm:$0xff]  ;;  %v59_v16 = vld [vmem:[#allocation2 + $0x78] sm:$0xff] }
  0x13   :  { %125 = vmatpush1.msra.mxu0 %v70_v5  ;;  %288 = vmatpush1.msra.mxu1 %v70_v5  ;;  %v58_v17 = vld [vmem:[#allocation2 + $0x70] sm:$0xff]  ;;  %v57_v18 = vld [vmem:[#allocation2 + $0x68] sm:$0xff]  ;;  %v56_v19 = vld [vmem:[#allocation2 + $0x60] sm:$0xff] }
  0x14   :  { %126 = vmatprep.subr.mxu0 %v69_v6  ;;  %257 = vmatprep.subr.mxu1 %v69_v6  ;;  %v55_v20 = vld [vmem:[#allocation2 + $0x58] sm:$0xff]  ;;  %v54_v21 = vld [vmem:[#allocation2 + $0x50] sm:$0xff]  ;;  %v53_v22 = vld [vmem:[#allocation2 + $0x48] sm:$0xff] }
  0x15   :  { %127 = vmatpush1.msra.mxu0 %v68_v7  ;;  %289 = vmatpush1.msra.mxu1 %v68_v7  ;;  %v52_v23 = vld [vmem:[#allocation2 + $0x40] sm:$0xff]  ;;  %v51_v24 = vld [vmem:[#allocation2 + $0x38] sm:$0xff]  ;;  %v50_v25 = vld [vmem:[#allocation2 + $0x30] sm:$0xff] }
  0x16   :  { %128 = vmatprep.subr.mxu0 %v67_v8  ;;  %258 = vmatprep.subr.mxu1 %v67_v8  ;;  %v49_v26 = vld [vmem:[#allocation2 + $0x28] sm:$0xff]  ;;  %v48_v27 = vld [vmem:[#allocation2 + $0x20] sm:$0xff]  ;;  %v47_v28 = vld [vmem:[#allocation2 + $0x18] sm:$0xff] }
  0x17   :  { %129 = vmatpush1.msra.mxu0 %v66_v9  ;;  %290 = vmatpush1.msra.mxu1 %v66_v9  ;;  %v46_v29 = vld [vmem:[#allocation2 + $0x10] sm:$0xff]  ;;  %v45_v30 = vld [vmem:[#allocation2 + $0x8] sm:$0xff]  ;;  %v44_v31 = vld [vmem:[#allocation2] sm:$0xff] }
  0x18   :  { %130 = vmatprep.subr.mxu0 %v65_v10  ;;  %259 = vmatprep.subr.mxu1 %v65_v10  ;;  %v107_v32 = vld [vmem:[#allocation2 + $0x1f8] sm:$0xff]  ;;  %v106_v33 = vld [vmem:[#allocation2 + $0x1f0] sm:$0xff]  ;;  %v105_v34 = vld [vmem:[#allocation2 + $0x1e8] sm:$0xff] }
  0x19   :  { %131 = vmatpush1.msra.mxu0 %v64_v11  ;;  %291 = vmatpush1.msra.mxu1 %v64_v11  ;;  %v104_v35 = vld [vmem:[#allocation2 + $0x1e0] sm:$0xff]  ;;  %v103_v36 = vld [vmem:[#allocation2 + $0x1d8] sm:$0xff]  ;;  %v102_v37 = vld [vmem:[#allocation2 + $0x1d0] sm:$0xff] }
  0x1a   :  { %132 = vmatprep.subr.mxu0 %v63_v12  ;;  %260 = vmatprep.subr.mxu1 %v63_v12  ;;  %v101_v38 = vld [vmem:[#allocation2 + $0x1c8] sm:$0xff]  ;;  %v100_v39 = vld [vmem:[#allocation2 + $0x1c0] sm:$0xff]  ;;  %v99_v40 = vld [vmem:[#allocation2 + $0x1b8] sm:$0xff] }
  0x1b   :  { %133 = vmatpush1.msra.mxu0 %v62_v13  ;;  %292 = vmatpush1.msra.mxu1 %v62_v13  ;;  %v98_v41 = vld [vmem:[#allocation2 + $0x1b0] sm:$0xff]  ;;  %v97_v42 = vld [vmem:[#allocation2 + $0x1a8] sm:$0xff]  ;;  %v96_v43 = vld [vmem:[#allocation2 + $0x1a0] sm:$0xff] }
  0x1c   :  { %134 = vmatprep.subr.mxu0 %v61_v14  ;;  %261 = vmatprep.subr.mxu1 %v61_v14  ;;  %v95_v44 = vld [vmem:[#allocation2 + $0x198] sm:$0xff]  ;;  %v94_v45 = vld [vmem:[#allocation2 + $0x190] sm:$0xff]  ;;  %v93_v46 = vld [vmem:[#allocation2 + $0x188] sm:$0xff] }
  0x1d   :  { %135 = vmatpush1.msra.mxu0 %v60_v15  ;;  %293 = vmatpush1.msra.mxu1 %v60_v15  ;;  %v92_v47 = vld [vmem:[#allocation2 + $0x180] sm:$0xff]  ;;  %v91_v48 = vld [vmem:[#allocation2 + $0x178] sm:$0xff]  ;;  %v90_v49 = vld [vmem:[#allocation2 + $0x170] sm:$0xff] }
  0x1e   :  { %136 = vmatprep.subr.mxu0 %v59_v16  ;;  %262 = vmatprep.subr.mxu1 %v59_v16  ;;  %v89_v50 = vld [vmem:[#allocation2 + $0x168] sm:$0xff]  ;;  %v88_v51 = vld [vmem:[#allocation2 + $0x160] sm:$0xff]  ;;  %v87_v52 = vld [vmem:[#allocation2 + $0x158] sm:$0xff]  ;;  %v110_v16 = vlaneseq }
  0x1f   :  { %137 = vmatpush1.msra.mxu0 %v58_v17  ;;  %294 = vmatpush1.msra.mxu1 %v58_v17  ;;  %v86_v53 = vld [vmem:[#allocation2 + $0x150] sm:$0xff]  ;;  %v85_v54 = vld [vmem:[#allocation2 + $0x148] sm:$0xff]  ;;  %v84_v55 = vld [vmem:[#allocation2 + $0x140] sm:$0xff] }
  0x20   :  { %138 = vmatprep.subr.mxu0 %v57_v18  ;;  %263 = vmatprep.subr.mxu1 %v57_v18  ;;  %v83_v56 = vld [vmem:[#allocation2 + $0x138] sm:$0xff]  ;;  %v82_v57 = vld [vmem:[#allocation2 + $0x130] sm:$0xff]  ;;  %v81_v58 = vld [vmem:[#allocation2 + $0x128] sm:$0xff]  ;;  %v111_v17 = vshrl.u32 %v110_v16, 7 }
  0x21   :  { %139 = vmatpush1.msra.mxu0 %v56_v19  ;;  %295 = vmatpush1.msra.mxu1 %v56_v19  ;;  %v80_v59 = vld [vmem:[#allocation2 + $0x120] sm:$0xff]  ;;  %v79_v60 = vld [vmem:[#allocation2 + $0x118] sm:$0xff]  ;;  %v78_v61 = vld [vmem:[#allocation2 + $0x110] sm:$0xff] }
  0x22   :  { %140 = vmatprep.subr.mxu0 %v55_v20  ;;  %264 = vmatprep.subr.mxu1 %v55_v20  ;;  %v77_v62 = vld [vmem:[#allocation2 + $0x108] sm:$0xff]  ;;  %v76_v63 = vld [vmem:[#allocation2 + $0x100] sm:$0xff]  ;;  %v31_v4 = vld [vmem:[%s468_s0 + $0x18] sm:$0xff]  ;;  %v112_v18 = vsub.s32 0, %v111_v17  ;;  %v116_v20 = vsub.s32 1, %v111_v17 }
  0x23   :  { %141 = vmatpush1.msra.mxu0 %v54_v21  ;;  %296 = vmatpush1.msra.mxu1 %v54_v21  ;;  %v29_v0 = vld [vmem:[%s468_s0 + $0x8] sm:$0xff]  ;;  %v28_v2 = vld [vmem:[%s468_s0] sm:$0xff]  ;;  %v39_v5 = vld [vmem:[%s468_s0 + $0x58] sm:$0xff] }
  0x24   :  { %142 = vmatprep.subr.mxu0 %v53_v22  ;;  %265 = vmatprep.subr.mxu1 %v53_v22  ;;  %v37_v1 = vld [vmem:[%s468_s0 + $0x48] sm:$0xff]  ;;  %v36_v3 = vld [vmem:[%s468_s0 + $0x40] sm:$0xff]  ;;  %v30_v6 = vld [vmem:[%s468_s0 + $0x10] sm:$0xff] }
  0x25   :  { %143 = vmatpush1.msra.mxu0 %v52_v23  ;;  %297 = vmatpush1.msra.mxu1 %v52_v23  ;;  %v38_v7 = vld [vmem:[%s468_s0 + $0x50] sm:$0xff]  ;;  %v33_v8 = vld [vmem:[%s468_s0 + $0x28] sm:$0xff]  ;;  %v32_v10 = vld [vmem:[%s468_s0 + $0x20] sm:$0xff] }
  0x26   :  { %144 = vmatprep.subr.mxu0 %v51_v24  ;;  %266 = vmatprep.subr.mxu1 %v51_v24  ;;  %v41_v9 = vld [vmem:[%s468_s0 + $0x68] sm:$0xff]  ;;  %v40_v11 = vld [vmem:[%s468_s0 + $0x60] sm:$0xff]  ;;  %v35_v12 = vld [vmem:[%s468_s0 + $0x38] sm:$0xff] }
  0x27   :  { %145 = vmatpush1.msra.mxu0 %v50_v25  ;;  %298 = vmatpush1.msra.mxu1 %v50_v25  ;;  %v43_v13 = vld [vmem:[%s468_s0 + $0x78] sm:$0xff]  ;;  %v34_v14 = vld [vmem:[%s468_s0 + $0x30] sm:$0xff]  ;;  %v108_v19 = vld [vmem:[%s470_s2] sm:$0x3] }
  0x28   :  { %146 = vmatprep.subr.mxu0 %v49_v26  ;;  %267 = vmatprep.subr.mxu1 %v49_v26  ;;  %v42_v15 = vld [vmem:[%s468_s0 + $0x70] sm:$0xff]  ;;  %v113_v21 = vrot.slane %v108_v19, %v112_v18  ;;  %v117_v22 = vrot.slane %v108_v19, %v116_v20 }
  0x29   :  { %147 = vmatpush1.msra.mxu0 %v48_v27  ;;  %299 = vmatpush1.msra.mxu1 %v48_v27 }
  0x2a   :  { %148 = vmatprep.subr.mxu0 %v47_v28  ;;  %268 = vmatprep.subr.mxu1 %v47_v28 }
  0x2b   :  { %149 = vmatpush1.msra.mxu0 %v46_v29  ;;  %300 = vmatpush1.msra.mxu1 %v46_v29 }
  0x2c   :  { %150 = vmatprep.subr.mxu0 %v45_v30  ;;  %269 = vmatprep.subr.mxu1 %v45_v30 }
  0x2d   :  { %151 = vmatpush1.msra.mxu0 %v44_v31  ;;  %301 = vmatpush1.msra.mxu1 %v44_v31 }
  0x2e   :  { %152 = vmatprep.subr.mxu0 %v107_v32  ;;  %270 = vmatprep.subr.mxu1 %v107_v32 }
  0x2f   :  { %153 = vmatpush2.msra.mxu0 %v106_v33  ;;  %302 = vmatpush2.msra.mxu1 %v106_v33 }
  0x30   :  { %154 = vmatprep.subr.mxu0 %v105_v34  ;;  %271 = vmatprep.subr.mxu1 %v105_v34 }
  0x31   :  { %155 = vmatpush2.msra.mxu0 %v104_v35  ;;  %303 = vmatpush2.msra.mxu1 %v104_v35 }
  0x32   :  { %156 = vmatprep.subr.mxu0 %v103_v36  ;;  %272 = vmatprep.subr.mxu1 %v103_v36 }
  0x33   :  { %157 = vmatpush2.msra.mxu0 %v102_v37  ;;  %304 = vmatpush2.msra.mxu1 %v102_v37 }
  0x34   :  { %158 = vmatprep.subr.mxu0 %v101_v38  ;;  %273 = vmatprep.subr.mxu1 %v101_v38 }
  0x35   :  { %159 = vmatpush2.msra.mxu0 %v100_v39  ;;  %305 = vmatpush2.msra.mxu1 %v100_v39 }
  0x36   :  { %160 = vmatprep.subr.mxu0 %v99_v40  ;;  %274 = vmatprep.subr.mxu1 %v99_v40 }
  0x37   :  { %161 = vmatpush2.msra.mxu0 %v98_v41  ;;  %306 = vmatpush2.msra.mxu1 %v98_v41 }
  0x38   :  { %162 = vmatprep.subr.mxu0 %v97_v42  ;;  %275 = vmatprep.subr.mxu1 %v97_v42 }
  0x39   :  { %163 = vmatpush2.msra.mxu0 %v96_v43  ;;  %307 = vmatpush2.msra.mxu1 %v96_v43 }
  0x3a   :  { %164 = vmatprep.subr.mxu0 %v95_v44  ;;  %276 = vmatprep.subr.mxu1 %v95_v44 }
  0x3b   :  { %165 = vmatpush2.msra.mxu0 %v94_v45  ;;  %308 = vmatpush2.msra.mxu1 %v94_v45 }
  0x3c   :  { %166 = vmatprep.subr.mxu0 %v93_v46  ;;  %277 = vmatprep.subr.mxu1 %v93_v46 }
  0x3d   :  { %167 = vmatpush2.msra.mxu0 %v92_v47  ;;  %309 = vmatpush2.msra.mxu1 %v92_v47 }
  0x3e   :  { %168 = vmatprep.subr.mxu0 %v91_v48  ;;  %278 = vmatprep.subr.mxu1 %v91_v48 }
  0x3f   :  { %169 = vmatpush2.msra.mxu0 %v90_v49  ;;  %310 = vmatpush2.msra.mxu1 %v90_v49 }
  0x40   :  { %170 = vmatprep.subr.mxu0 %v89_v50  ;;  %279 = vmatprep.subr.mxu1 %v89_v50 }
  0x41   :  { %171 = vmatpush2.msra.mxu0 %v88_v51  ;;  %311 = vmatpush2.msra.mxu1 %v88_v51 }
  0x42   :  { %172 = vmatprep.subr.mxu0 %v87_v52  ;;  %280 = vmatprep.subr.mxu1 %v87_v52 }
  0x43   :  { %173 = vmatpush2.msra.mxu0 %v86_v53  ;;  %312 = vmatpush2.msra.mxu1 %v86_v53 }
  0x44   :  { %174 = vmatprep.subr.mxu0 %v85_v54  ;;  %281 = vmatprep.subr.mxu1 %v85_v54 }
  0x45   :  { %175 = vmatpush2.msra.mxu0 %v84_v55  ;;  %313 = vmatpush2.msra.mxu1 %v84_v55 }
  0x46   :  { %176 = vmatprep.subr.mxu0 %v83_v56  ;;  %282 = vmatprep.subr.mxu1 %v83_v56 }
  0x47   :  { %177 = vmatpush2.msra.mxu0 %v82_v57  ;;  %314 = vmatpush2.msra.mxu1 %v82_v57 }
  0x48   :  { %178 = vmatprep.subr.mxu0 %v81_v58  ;;  %283 = vmatprep.subr.mxu1 %v81_v58 }
  0x49   :  { %179 = vmatpush2.msra.mxu0 %v80_v59  ;;  %315 = vmatpush2.msra.mxu1 %v80_v59 }
  0x4a   :  { %180 = vmatprep.subr.mxu0 %v79_v60  ;;  %284 = vmatprep.subr.mxu1 %v79_v60 }
  0x4b   :  { %181 = vmatpush2.msra.mxu0 %v78_v61  ;;  %316 = vmatpush2.msra.mxu1 %v78_v61 }
  0x4c   :  { %182 = vmatprep.subr.mxu0 %v77_v62  ;;  %285 = vmatprep.subr.mxu1 %v77_v62 }
  0x4d   :  { %183 = vmatpush2.msra.mxu0 %v76_v63  ;;  %317 = vmatpush2.msra.mxu1 %v76_v63 }
  0x4e   :  { %184 = vmatprep.mubr.f32.mxu0 %v29_v0  ;;  %208 = vmatprep.mubr.f32.mxu1 %v37_v1 }
  0x4f   :  { %185 = vmatmul.mubr.f32.vlgmr.msra.gmra.mxu0 %v28_v2  ;;  %209 = vmatmul.mubr.f32.vlgmr.msra.gmra.mxu1 %v36_v3 }
  0x50   :  { %190 = vmatprep.mubr.f32.mxu0 %v31_v4  ;;  %214 = vmatprep.mubr.f32.mxu1 %v39_v5 }
  0x53   :  { %191 = vmatmul.mubr.f32.gmra.mxu0 %v30_v6  ;;  %215 = vmatmul.mubr.f32.gmra.mxu1 %v38_v7 }
  0x54   :  { %196 = vmatprep.mubr.f32.mxu0 %v33_v8  ;;  %220 = vmatprep.mubr.f32.mxu1 %v41_v9 }
  0x57   :  { %197 = vmatmul.mubr.f32.gmra.mxu0 %v32_v10  ;;  %221 = vmatmul.mubr.f32.gmra.mxu1 %v40_v11 }
  0x58   :  { %202 = vmatprep.mubr.f32.mxu0 %v35_v12  ;;  %226 = vmatprep.mubr.f32.mxu1 %v43_v13 }
  0x5b   :  { %203 = vmatmul.mubr.f32.gmra.mxu0 %v34_v14  ;;  %227 = vmatmul.mubr.f32.gmra.mxu1 %v42_v15 }
 0x10f   :  { %v186_v23 = vpop.f32.mrf.mxu0  ;;  %v210_v24 = vpop.f32.mrf.mxu1 }
 0x110   :  { %v187_v25 = vadd.f32 %v186_v23, %v113_v21  ;;  %v211_v26 = vadd.f32 %v210_v24, %v113_v21 }
 0x111   :  { %v188_v27 = vpop.f32.mrf.mxu0  ;;  %v212_v28 = vpop.f32.mrf.mxu1 }
 0x112   :  { %233 = vst [vmem:[%s471_s3] sm:$0xff] %v187_v25  ;;  %241 = vst [vmem:[%s471_s3 + $0x40] sm:$0xff] %v211_v26  ;;  %v189_v29 = vadd.f32 %v188_v27, %v117_v22  ;;  %v213_v30 = vadd.f32 %v212_v28, %v117_v22 }
 0x113   :  { %v192_v31 = vpop.f32.mrf.mxu0  ;;  %v216_v32 = vpop.f32.mrf.mxu1 }
 0x114   :  { %234 = vst [vmem:[%s471_s3 + $0x8] sm:$0xff] %v189_v29  ;;  %242 = vst [vmem:[%s471_s3 + $0x48] sm:$0xff] %v213_v30  ;;  %v193_v33 = vadd.f32 %v192_v31, %v113_v21  ;;  %v217_v34 = vadd.f32 %v216_v32, %v113_v21 }
 0x115   :  { %v194_v35 = vpop.f32.mrf.mxu0  ;;  %v218_v36 = vpop.f32.mrf.mxu1 }
 0x116   :  { %235 = vst [vmem:[%s471_s3 + $0x10] sm:$0xff] %v193_v33  ;;  %243 = vst [vmem:[%s471_s3 + $0x50] sm:$0xff] %v217_v34  ;;  %v195_v37 = vadd.f32 %v194_v35, %v117_v22  ;;  %v219_v38 = vadd.f32 %v218_v36, %v117_v22 }
 0x117   :  { %v198_v39 = vpop.f32.mrf.mxu0  ;;  %v222_v40 = vpop.f32.mrf.mxu1 }
 0x118   :  { %236 = vst [vmem:[%s471_s3 + $0x18] sm:$0xff] %v195_v37  ;;  %244 = vst [vmem:[%s471_s3 + $0x58] sm:$0xff] %v219_v38  ;;  %v199_v41 = vadd.f32 %v198_v39, %v113_v21  ;;  %v223_v42 = vadd.f32 %v222_v40, %v113_v21 }
 0x119   :  { %v200_v43 = vpop.f32.mrf.mxu0  ;;  %v224_v44 = vpop.f32.mrf.mxu1 }
 0x11a   :  { %237 = vst [vmem:[%s471_s3 + $0x20] sm:$0xff] %v199_v41  ;;  %245 = vst [vmem:[%s471_s3 + $0x60] sm:$0xff] %v223_v42  ;;  %v201_v45 = vadd.f32 %v200_v43, %v117_v22  ;;  %v225_v46 = vadd.f32 %v224_v44, %v117_v22 }
 0x11b   :  { %v204_v47 = vpop.f32.mrf.mxu0  ;;  %v228_v48 = vpop.f32.mrf.mxu1 }
 0x11c   :  { %238 = vst [vmem:[%s471_s3 + $0x28] sm:$0xff] %v201_v45  ;;  %246 = vst [vmem:[%s471_s3 + $0x68] sm:$0xff] %v225_v46  ;;  %v205_v49 = vadd.f32 %v204_v47, %v113_v21  ;;  %v229_v50 = vadd.f32 %v228_v48, %v113_v21 }
 0x11d   :  { %v206_v51 = vpop.f32.mrf.mxu0  ;;  %v230_v52 = vpop.f32.mrf.mxu1 }
 0x11e   :  { %239 = vst [vmem:[%s471_s3 + $0x30] sm:$0xff] %v205_v49  ;;  %247 = vst [vmem:[%s471_s3 + $0x70] sm:$0xff] %v229_v50  ;;  %v207_v53 = vadd.f32 %v206_v51, %v117_v22  ;;  %v231_v54 = vadd.f32 %v230_v52, %v117_v22 }
 0x120   :  { %240 = vst [vmem:[%s471_s3 + $0x38] sm:$0xff] %v207_v53  ;;  %248 = vst [vmem:[%s471_s3 + $0x78] sm:$0xff] %v231_v54 }
 0x121   :  { %253 = vsyncpa [#allocation3], 1 }

// kernel: lstm_model_forward.3
= control target key start
LH: loop header
LB: loop body
LE: loop exit
PB: predicated region body
PF: predicated region fallthrough
CT: control target
= control target key end

     0   :  { %vm27_vm0 = vcmask 523264   ;;  %v3501_v3 = vmov 0.0   ;;  %s2248_s7 = smov 64   ;;  %s3493_s1 = inlined_call_operand.vmem [shape: f32[64,256], index: 1, kind: input, shape index: {}]   ;;  %s3494_s0 = inlined_call_operand.vmem [shape: f32[8,8,256], index: 0, kind: input, shape index: {}]   ;;  %s3495_s2 = inlined_call_operand.vmem [shape: f32[128,256], index: 2, kind: input, shape index: {}]   ;;  %s3496_s3 = inlined_call_operand.vmem [shape: f32[1,256], index: 3, kind: input, shape index: {}]   ;;  %s3497_s4 = inlined_call_operand.vmem [shape: f32[64,256], index: 4, kind: input, shape index: {}]   ;;  %s3498_s5 = inlined_call_operand.vmem [shape: f32[1,256], index: 5, kind: input, shape index: {}]   ;;  %s3499_s6 = inlined_call_operand.vmem [shape: f32[8,256], index: 6, kind: output, shape index: {}]  }
   0x1   :  { %v2287_v0 = vld [vmem:[%s3493_s1 + $0x78] sm:$0xff]  ;;  %v2292_v1 = vld [vmem:[%s3493_s1 + $0x70] sm:$0xff]  ;;  %v2297_v2 = vld [vmem:[%s3493_s1 + $0x68] sm:$0xff]  ;;  %169 = vmatprep.mubr.f32.mxu0 %v3501_v3  ;;  %28 = vst.msk [vmem:[#allocation2] sm:$0xff] %vm27_vm0, %v3501_v3  ;;  %281 = vmatprep.mubr.f32.mxu1 %v3501_v3 }
   0x2   :  { %29 = vst.msk [vmem:[#allocation2 + $0x8] sm:$0xff] %vm27_vm0, %v3501_v3  ;;  %30 = vst.msk [vmem:[#allocation2 + $0x10] sm:$0xff] %vm27_vm0, %v3501_v3  ;;  %121 = vmatprep.subr.mxu0 %v2287_v0  ;;  %v2313_v4 = vld [vmem:[%s3493_s1 + $0x60] sm:$0xff]  ;;  %v2319_v5 = vld [vmem:[%s3493_s1 + $0x58] sm:$0xff] }
   0x3   :  { %31 = vst.msk [vmem:[#allocation2 + $0x18] sm:$0xff] %vm27_vm0, %v3501_v3  ;;  %122 = vmatpush1.msra.mxu0 %v2292_v1  ;;  %v2325_v6 = vld [vmem:[%s3493_s1 + $0x50] sm:$0xff]  ;;  %v2331_v7 = vld [vmem:[%s3493_s1 + $0x48] sm:$0xff]  ;;  %v2337_v8 = vld [vmem:[%s3493_s1 + $0x40] sm:$0xff] }
   0x4   :  { %123 = vmatprep.subr.mxu0 %v2297_v2  ;;  %v2343_v9 = vld [vmem:[%s3493_s1 + $0x38] sm:$0xff]  ;;  %v2349_v10 = vld [vmem:[%s3493_s1 + $0x30] sm:$0xff]  ;;  %v2355_v11 = vld [vmem:[%s3493_s1 + $0x28] sm:$0xff] }
   0x5   :  { %124 = vmatpush1.msra.mxu0 %v2313_v4  ;;  %v2361_v12 = vld [vmem:[%s3493_s1 + $0x20] sm:$0xff]  ;;  %v2367_v13 = vld [vmem:[%s3493_s1 + $0x18] sm:$0xff]  ;;  %v2373_v14 = vld [vmem:[%s3493_s1 + $0x10] sm:$0xff] }
   0x6   :  { %125 = vmatprep.subr.mxu0 %v2319_v5  ;;  %3520 = vst [vmem:[#allocation3_spill] sm:$0xff] %v2373_v14  ;;  %v2379_v15 = vld [vmem:[%s3493_s1 + $0x8] sm:$0xff]  ;;  %v2385_v16 = vld [vmem:[%s3493_s1] sm:$0xff]  ;;  %v2427_v33 = vld [vmem:[%s3495_s2 + $0xf8] sm:$0xff] }
   0x7   :  { %126 = vmatpush1.msra.mxu0 %v2325_v6  ;;  %3521 = vst [vmem:[#allocation4_spill] sm:$0xff] %v2379_v15  ;;  %3522 = vst [vmem:[#allocation5_spill] sm:$0xff] %v2385_v16  ;;  %v100_v19 = vld [vmem:[%s3494_s0 + $0x8] sm:$0xff]  ;;  %v99_v24 = vld [vmem:[%s3494_s0] sm:$0xff]  ;;  %217 = vmatprep.subr.mxu1 %v2427_v33 }
   0x8   :  { %127 = vmatprep.subr.mxu0 %v2331_v7  ;;  %v92_v17 = vld [vmem:[#allocation2] sm:$0xff]  ;;  %3523 = vst [vmem:[#allocation6_spill] sm:$0xff] %v2427_v33  ;;  %v2432_v34 = vld [vmem:[%s3495_s2 + $0xf0] sm:$0xff]  ;;  %v2437_v35 = vld [vmem:[%s3495_s2 + $0xe8] sm:$0xff] }
   0x9   :  { %128 = vmatpush1.msra.mxu0 %v2337_v8  ;;  %v94_v23 = vld [vmem:[#allocation2 + $0x8] sm:$0xff]  ;;  %v96_v32 = vld [vmem:[#allocation2 + $0x10] sm:$0xff]  ;;  %v2443_v36 = vld [vmem:[%s3495_s2 + $0xe0] sm:$0xff]  ;;  %218 = vmatpush1.msra.mxu1 %v2432_v34 }
   0xa   :  { %129 = vmatprep.subr.mxu0 %v2343_v9  ;;  %v2450_v37 = vld [vmem:[%s3495_s2 + $0xd8] sm:$0xff]  ;;  %219 = vmatprep.subr.mxu1 %v2437_v35  ;;  %v2456_v38 = vld [vmem:[%s3495_s2 + $0xd0] sm:$0xff]  ;;  %v2462_v39 = vld [vmem:[%s3495_s2 + $0xc8] sm:$0xff] }
   0xb   :  { %130 = vmatpush1.msra.mxu0 %v2349_v10  ;;  %220 = vmatpush1.msra.mxu1 %v2443_v36  ;;  %v2468_v40 = vld [vmem:[%s3495_s2 + $0xc0] sm:$0xff]  ;;  %v2474_v41 = vld [vmem:[%s3495_s2 + $0xb8] sm:$0xff]  ;;  %v2480_v42 = vld [vmem:[%s3495_s2 + $0xb0] sm:$0xff] }
   0xc   :  { %131 = vmatprep.subr.mxu0 %v2355_v11  ;;  %221 = vmatprep.subr.mxu1 %v2450_v37  ;;  %v2486_v43 = vld [vmem:[%s3495_s2 + $0xa8] sm:$0xff]  ;;  %v2492_v44 = vld [vmem:[%s3495_s2 + $0xa0] sm:$0xff]  ;;  %v2498_v45 = vld [vmem:[%s3495_s2 + $0x98] sm:$0xff] }
   0xd   :  { %132 = vmatpush1.msra.mxu0 %v2361_v12  ;;  %222 = vmatpush1.msra.mxu1 %v2456_v38  ;;  %v2504_v46 = vld [vmem:[%s3495_s2 + $0x90] sm:$0xff]  ;;  %v2510_v47 = vld [vmem:[%s3495_s2 + $0x88] sm:$0xff]  ;;  %v2516_v48 = vld [vmem:[%s3495_s2 + $0x80] sm:$0xff] }
   0xe   :  { %133 = vmatprep.subr.mxu0 %v2367_v13  ;;  %223 = vmatprep.subr.mxu1 %v2462_v39  ;;  %v2522_v49 = vld [vmem:[%s3495_s2 + $0x78] sm:$0xff]  ;;  %v2528_v50 = vld [vmem:[%s3495_s2 + $0x70] sm:$0xff]  ;;  %v2534_v51 = vld [vmem:[%s3495_s2 + $0x68] sm:$0xff] }
   0xf   :  { %134 = vmatpush1.msra.mxu0 %v2373_v14  ;;  %224 = vmatpush1.msra.mxu1 %v2468_v40  ;;  %v2540_v52 = vld [vmem:[%s3495_s2 + $0x60] sm:$0xff]  ;;  %v2546_v53 = vld [vmem:[%s3495_s2 + $0x58] sm:$0xff]  ;;  %v2552_v54 = vld [vmem:[%s3495_s2 + $0x50] sm:$0xff] }
  0x10   :  { %135 = vmatprep.subr.mxu0 %v2379_v15  ;;  %225 = vmatprep.subr.mxu1 %v2474_v41  ;;  %v2558_v55 = vld [vmem:[%s3495_s2 + $0x48] sm:$0xff]  ;;  %v2564_v56 = vld [vmem:[%s3495_s2 + $0x40] sm:$0xff]  ;;  %v2570_v57 = vld [vmem:[%s3495_s2 + $0x38] sm:$0xff] }
  0x11   :  { %136 = vmatpush1.msra.mxu0 %v2385_v16  ;;  %226 = vmatpush1.msra.mxu1 %v2480_v42  ;;  %v2576_v58 = vld [vmem:[%s3495_s2 + $0x30] sm:$0xff]  ;;  %v2582_v59 = vld [vmem:[%s3495_s2 + $0x28] sm:$0xff]  ;;  %v2588_v60 = vld [vmem:[%s3495_s2 + $0x20] sm:$0xff] }
  0x12   :  { %1950 = vmatmul.mubr.msk.f32.vlgmr.msra.gmra.mxu0 %vm27_vm0, %v92_v17  ;;  %344 = vmatprep.subr.mxu0 %v2287_v0  ;;  %v2594_v61 = vld [vmem:[%s3495_s2 + $0x18] sm:$0xff] }
  0x13   :  { %345 = vmatpush1.msra.mxu0 %v2292_v1  ;;  %392 = vmatprep.mubr.f32.mxu0 %v3501_v3 }
  0x14   :  { %346 = vmatprep.subr.mxu0 %v2297_v2  ;;  %227 = vmatprep.subr.mxu1 %v2486_v43 }
  0x15   :  { %347 = vmatpush1.msra.mxu0 %v2313_v4  ;;  %228 = vmatpush1.msra.mxu1 %v2492_v44 }
  0x16   :  { %348 = vmatprep.subr.mxu0 %v2319_v5  ;;  %229 = vmatprep.subr.mxu1 %v2498_v45 }
  0x17   :  { %349 = vmatpush1.msra.mxu0 %v2325_v6  ;;  %230 = vmatpush1.msra.mxu1 %v2504_v46 }
  0x18   :  { %350 = vmatprep.subr.mxu0 %v2331_v7  ;;  %231 = vmatprep.subr.mxu1 %v2510_v47 }
  0x19   :  { %351 = vmatpush1.msra.mxu0 %v2337_v8  ;;  %232 = vmatpush1.msra.mxu1 %v2516_v48 }
  0x1a   :  { %352 = vmatprep.subr.mxu0 %v2343_v9  ;;  %233 = vmatprep.subr.mxu1 %v2522_v49 }
  0x1b   :  { %353 = vmatpush1.msra.mxu0 %v2349_v10  ;;  %234 = vmatpush1.msra.mxu1 %v2528_v50 }
  0x1c   :  { %354 = vmatprep.subr.mxu0 %v2355_v11  ;;  %235 = vmatprep.subr.mxu1 %v2534_v51 }
  0x1d   :  { %355 = vmatpush1.msra.mxu0 %v2361_v12  ;;  %236 = vmatpush1.msra.mxu1 %v2540_v52 }
  0x1e   :  { %356 = vmatprep.subr.mxu0 %v2367_v13  ;;  %237 = vmatprep.subr.mxu1 %v2546_v53 }
  0x1f   :  { %357 = vmatpush1.msra.mxu0 %v2373_v14  ;;  %238 = vmatpush1.msra.mxu1 %v2552_v54 }
  0x20   :  { %358 = vmatprep.subr.mxu0 %v2379_v15  ;;  %239 = vmatprep.subr.mxu1 %v2558_v55 }
  0x21   :  { %359 = vmatpush1.msra.mxu0 %v2385_v16  ;;  %240 = vmatpush1.msra.mxu1 %v2564_v56 }
  0x22   :  { %436 = vmatprep.subr.mxu0 %v2427_v33  ;;  %241 = vmatprep.subr.mxu1 %v2570_v57 }
  0x23   :  { %242 = vmatpush1.msra.mxu1 %v2576_v58 }
  0x24   :  { %243 = vmatprep.subr.mxu1 %v2582_v59 }
  0x25   :  { %244 = vmatpush1.msra.mxu1 %v2588_v60 }
  0x26   :  { %245 = vmatprep.subr.mxu1 %v2594_v61 }
  0xd2   :  { %v171_v18 = vpop.f32.mrf.mxu0 }
  0xd3   :  { %v176_v25 = vadd.f32 %v171_v18, %v99_v24 }
  0xd4   :  { %v173_v20 = vpop.f32.mrf.mxu0 }
  0xd5   :  { %v2411_v21 = vadd.f32 %v173_v20, %v100_v19  ;;  %v1951_v26 = vmul.f32 -1.442695, %v176_v25  ;;  %v2606_v19 = vld [vmem:[%s3495_s2 + $0x10] sm:$0xff]  ;;  %v2612_v20 = vld [vmem:[%s3495_s2 + $0x8] sm:$0xff] }
  0xd6   :  { %246 = vmatpush1.msra.mxu1 %v2606_v19 }
  0xd7   :  { %2007 = vtanh.f32 %v2411_v21  ;;  %247 = vmatprep.subr.mxu1 %v2612_v20  ;;  %v1952_v25 = vmul.f32 -1.442695, %v2411_v21  ;;  %v82_v21 = vlaneseq }
  0xd8   :  { %2009 = vpow2.f32 %v1951_v26 }
  0xe4   :  { %v2008_v22 = vpop.eup %2007 }
  0xe5   :  { %197 = vrot.lane.b32.xlu0 %v2008_v22, %s2248_s7  ;;  %v2010_v27 = vpop.eup %2009  ;;  %v2617_v22 = vld [vmem:[%s3495_s2] sm:$0xff] }
  0xe6   :  { %v184_v28 = vadd.f32 1.0, %v2010_v27  ;;  %248 = vmatpush1.msra.mxu1 %v2617_v22 }
  0xe7   :  { %559 = vmatprep.subr.mxu1 %v2287_v0 }
  0xe8   :  { %2011 = vrcp.f32 %v184_v28 }
  0xe9   :  { %192 = vrot.lane.b32.xlu0 %v94_v23, %s2248_s7  ;;  %v98_v23 = vld [vmem:[#allocation2 + $0x18] sm:$0xff] }
  0xed   :  { %213 = vrot.lane.b32.xlu0 %v96_v32, %s2248_s7 }
  0xf1   :  { %302 = vrot.lane.b32.xlu0 %v98_v23, %s2248_s7 }
  0xf5   :  { %v2419_v29 = vpop.eup %2011 }
 0x157   :  { %v198_v30 = vpop.permute.xlu0 %197 }
 0x158   :  { %v200_v31 = vmul.f32 %v2419_v29, %v198_v30 }
 0x15a   :  { %202 = vrot.lane.b32.xlu1 %v200_v31, %s2248_s7 }
 0x15b   :  { %v193_v62 = vpop.permute.xlu0 %192 }
 0x15c   :  { %v195_v63 = vmul.f32 %v2419_v29, %v193_v62  ;;  %v2677_v62 = vshrl.u32 %v82_v21, 7 }
 0x15e   :  { %3524 = vst [vmem:[#allocation7_spill] sm:$0xff] %v2677_v62  ;;  %v3511_v21 = vsub.s32 0, %v2677_v62 }
 0x15f   :  { %v214_v30 = vpop.permute.xlu0 %213 }
 0x1cc   :  { %v203_v17 = vpop.permute.xlu1 %202 }
 0x1cd   :  { %v2600_v18 = vadd.f32 %v203_v17, %v195_v63  ;;  %v3500_v63 = vsub.s32 1, %v2677_v62  ;;  %v80_v17 = vld [vmem:[%s3496_s3] sm:$0x3] }
 0x1cf   :  { %2013 = vtanh.f32 %v2600_v18 }
 0x1d0   :  { %2015 = vpow2.f32 %v1952_v25 }
 0x1dc   :  { %v2014_v24 = vpop.eup %2013 }
 0x1dd   :  { %208 = vrot.lane.b32.xlu1 %v2014_v24, %s2248_s7  ;;  %v2016_v26 = vpop.eup %2015  ;;  %v2685_v24 = vrot.slane %v80_v17, %v3500_v63  ;;  %v2696_v63 = vrot.slane %v80_v17, %v3511_v21 }
 0x1de   :  { %v185_v27 = vadd.f32 1.0, %v2016_v26 }
 0x1df   :  { %3525 = vst [vmem:[#allocation8_spill] sm:$0xff] %v2685_v24  ;;  %3526 = vst [vmem:[#allocation9_spill] sm:$0xff] %v2696_v63 }
 0x1e0   :  { %2017 = vrcp.f32 %v185_v27 }
 0x1ed   :  { %v2018_v28 = vpop.eup %2017 }
 0x24f   :  { %v209_v29 = vpop.permute.xlu1 %208 }
 0x250   :  { %v211_v31 = vmul.f32 %v2018_v28, %v209_v29  ;;  %v1956_v28 = vld [vmem:[%s3494_s0 + $0x18] sm:$0xff] }
 0x252   :  { %1957 = vmatmul.mubr.msk.f32.vlgmr.msra.gmra.mxu0 %vm27_vm0, %v211_v31  ;;  %v216_v32 = vsel %vm27_vm0, %v211_v31, %v214_v30 }
 0x253   :  { %282 = vmatmul.mubr.f32.vlgmr.msra.gmra.mxu1 %v216_v32  ;;  %437 = vmatpush1.msra.mxu0 %v2432_v34 }
 0x254   :  { %560 = vmatpush1.msra.mxu1 %v2292_v1  ;;  %607 = vmatprep.mubr.f32.mxu1 %v3501_v3 }
 0x255   :  { %561 = vmatprep.subr.mxu1 %v2297_v2  ;;  %438 = vmatprep.subr.mxu0 %v2437_v35 }
 0x256   :  { %562 = vmatpush1.msra.mxu1 %v2313_v4  ;;  %439 = vmatpush1.msra.mxu0 %v2443_v36 }
 0x257   :  { %563 = vmatprep.subr.mxu1 %v2319_v5  ;;  %440 = vmatprep.subr.mxu0 %v2450_v37 }
 0x258   :  { %564 = vmatpush1.msra.mxu1 %v2325_v6  ;;  %441 = vmatpush1.msra.mxu0 %v2456_v38 }
 0x259   :  { %565 = vmatprep.subr.mxu1 %v2331_v7  ;;  %442 = vmatprep.subr.mxu0 %v2462_v39 }
 0x25a   :  { %566 = vmatpush1.msra.mxu1 %v2337_v8  ;;  %443 = vmatpush1.msra.mxu0 %v2468_v40 }
 0x25b   :  { %567 = vmatprep.subr.mxu1 %v2343_v9  ;;  %444 = vmatprep.subr.mxu0 %v2474_v41 }
 0x25c   :  { %568 = vmatpush1.msra.mxu1 %v2349_v10  ;;  %445 = vmatpush1.msra.mxu0 %v2480_v42 }
 0x25d   :  { %569 = vmatprep.subr.mxu1 %v2355_v11  ;;  %446 = vmatprep.subr.mxu0 %v2486_v43 }
 0x25e   :  { %570 = vmatpush1.msra.mxu1 %v2361_v12  ;;  %447 = vmatpush1.msra.mxu0 %v2492_v44 }
 0x25f   :  { %571 = vmatprep.subr.mxu1 %v2367_v13  ;;  %448 = vmatprep.subr.mxu0 %v2498_v45 }
 0x260   :  { %572 = vmatpush1.msra.mxu1 %v2373_v14  ;;  %449 = vmatpush1.msra.mxu0 %v2504_v46 }
 0x261   :  { %573 = vmatprep.subr.mxu1 %v2379_v15  ;;  %450 = vmatprep.subr.mxu0 %v2510_v47 }
 0x262   :  { %574 = vmatpush1.msra.mxu1 %v2385_v16  ;;  %451 = vmatpush1.msra.mxu0 %v2516_v48 }
 0x263   :  { %452 = vmatprep.subr.mxu0 %v2522_v49  ;;  %500 = vmatprep.mubr.f32.mxu0 %v3501_v3 }
 0x264   :  { %453 = vmatpush1.msra.mxu0 %v2528_v50  ;;  %651 = vmatprep.subr.mxu1 %v2427_v33 }
 0x265   :  { %454 = vmatprep.subr.mxu0 %v2534_v51 }
 0x266   :  { %455 = vmatpush1.msra.mxu0 %v2540_v52 }
 0x267   :  { %456 = vmatprep.subr.mxu0 %v2546_v53 }
 0x268   :  { %457 = vmatpush1.msra.mxu0 %v2552_v54 }
 0x269   :  { %458 = vmatprep.subr.mxu0 %v2558_v55 }
 0x26a   :  { %459 = vmatpush1.msra.mxu0 %v2564_v56 }
 0x26b   :  { %460 = vmatprep.subr.mxu0 %v2570_v57 }
 0x26c   :  { %461 = vmatpush1.msra.mxu0 %v2576_v58 }
 0x26d   :  { %462 = vmatprep.subr.mxu0 %v2582_v59 }
 0x26e   :  { %463 = vmatpush1.msra.mxu0 %v2588_v60 }
 0x26f   :  { %464 = vmatprep.subr.mxu0 %v2594_v61 }
 0x270   :  { %465 = vmatpush1.msra.mxu0 %v2606_v19 }
 0x271   :  { %466 = vmatprep.subr.mxu0 %v2612_v20 }
 0x272   :  { %467 = vmatpush1.msra.mxu0 %v2617_v22 }
 0x273   :  { %774 = vmatprep.subr.mxu0 %v2287_v0 }
 0x312   :  { %v394_v25 = vpop.f32.mrf.mxu0 }
 0x313   :  { %v283_v23 = vpop.f32.mrf.mxu1 }
 0x314   :  { %v396_v29 = vpop.f32.mrf.mxu0 }
 0x315   :  { %v285_v26 = vpop.f32.mrf.mxu1  ;;  %v400_v30 = vadd.f32 %v1956_v28, %v396_v29  ;;  %v1955_v28 = vld [vmem:[%s3494_s0 + $0x10] sm:$0xff] }
 0x316   :  { %v286_v27 = vadd.f32 %v285_v26, %v2685_v24  ;;  %v284_v26 = vadd.f32 %v283_v23, %v2696_v63  ;;  %v399_v29 = vadd.f32 %v1955_v28, %v394_v25  ;;  %v303_v25 = vpop.permute.xlu0 %302 }
 0x318   :  { %2019 = vtanh.f32 %v286_v27  ;;  %v1953_v3 = vmul.f32 -1.442695, %v284_v26  ;;  %v1958_v24 = vmul.f32 -1.442695, %v399_v29 }
 0x319   :  { %2021 = vtanh.f32 %v400_v30 }
 0x31a   :  { %2023 = vpow2.f32 %v1953_v3 }
 0x31b   :  { %2025 = vpow2.f32 %v1958_v24 }
 0x325   :  { %v2020_v31 = vpop.eup %2019 }
 0x326   :  { %307 = vrot.lane.b32.xlu1 %v2020_v31, %s2248_s7  ;;  %v2022_v32 = vpop.eup %2021 }
 0x327   :  { %v2024_v31 = vpop.eup %2023 }
 0x328   :  { %v294_v33 = vadd.f32 1.0, %v2024_v31 }
 0x32a   :  { %416 = vrot.lane.b32.xlu1 %v2022_v32, %s2248_s7  ;;  %v2026_v32 = vpop.eup %2025  ;;  %2027 = vrcp.f32 %v294_v33 }
 0x32b   :  { %v407_v16 = vadd.f32 1.0, %v2026_v32 }
 0x32d   :  { %2029 = vrcp.f32 %v407_v16 }
 0x337   :  { %v2028_v62 = vpop.eup %2027 }
 0x338   :  { %v305_v26 = vmul.f32 %v2028_v62, %v303_v25 }
 0x33a   :  { %v2030_v23 = vpop.eup %2029 }
 0x33b   :  { %v414_v33 = vmul.f32 %v2030_v23, %v2600_v18 }
 0x398   :  { %v308_v17 = vpop.permute.xlu1 %307 }
 0x399   :  { %v310_v21 = vmul.f32 %v2028_v62, %v308_v17  ;;  %v1959_v62 = vmul.f32 -1.442695, %v400_v30 }
 0x39b   :  { %312 = vrot.lane.b32.xlu0 %v310_v21, %s2248_s7 }
 0x39c   :  { %v417_v63 = vpop.permute.xlu1 %416 }
 0x39d   :  { %v419_v15 = vmul.f32 %v2030_v23, %v417_v63 }
 0x39f   :  { %421 = vrot.lane.b32.xlu1 %v419_v15, %s2248_s7  ;;  %v1954_v15 = vmul.f32 -1.442695, %v286_v27  ;;  %v3527_v27 = vmov 0.0  }
 0x40d   :  { %v313_v3 = vpop.permute.xlu0 %312 }
 0x40e   :  { %v2704_v24 = vadd.f32 %v313_v3, %v305_v26 }
 0x410   :  { %2031 = vtanh.f32 %v2704_v24 }
 0x411   :  { %v422_v16 = vpop.permute.xlu1 %421 }
 0x412   :  { %v2708_v28 = vadd.f32 %v422_v16, %v414_v33 }
 0x414   :  { %2033 = vtanh.f32 %v2708_v28 }
 0x415   :  { %2035 = vpow2.f32 %v1954_v15  ;;  %v3530_v15 = vld [vmem:[#allocation6_spill] sm:$0xff] }
 0x416   :  { %2037 = vpow2.f32 %v1959_v62 }
 0x41d   :  { %v2032_v21 = vpop.eup %2031 }
 0x41e   :  { %318 = vrot.lane.b32.xlu0 %v2032_v21, %s2248_s7  ;;  %v3528_v21 = vld [vmem:[#allocation4_spill] sm:$0xff] }
 0x421   :  { %v2034_v63 = vpop.eup %2033 }
 0x422   :  { %427 = vrot.lane.b32.xlu1 %v2034_v63, %s2248_s7  ;;  %v2036_v29 = vpop.eup %2035  ;;  %v3529_v63 = vld [vmem:[#allocation5_spill] sm:$0xff] }
 0x423   :  { %v295_v31 = vadd.f32 1.0, %v2036_v29  ;;  %v2038_v32 = vpop.eup %2037  ;;  %v1963_v29 = vld [vmem:[%s3494_s0 + $0x28] sm:$0xff] }
 0x424   :  { %v408_v17 = vadd.f32 1.0, %v2038_v32 }
 0x425   :  { %2039 = vrcp.f32 %v295_v31 }
 0x426   :  { %2041 = vrcp.f32 %v408_v17 }
 0x432   :  { %v2040_v18 = vpop.eup %2039 }
 0x433   :  { %v2042_v26 = vpop.eup %2041 }
 0x490   :  { %v319_v23 = vpop.permute.xlu0 %318 }
 0x491   :  { %v321_v25 = vmul.f32 %v2040_v18, %v319_v23  ;;  %v1962_v18 = vld [vmem:[%s3494_s0 + $0x20] sm:$0xff] }
 0x493   :  { %432 = vrot.lane.b32.xlu0 %v321_v25, %s2248_s7 }
 0x494   :  { %v428_v3 = vpop.permute.xlu1 %427 }
 0x495   :  { %v430_v33 = vmul.f32 %v2042_v26, %v428_v3 }
 0x497   :  { %1964 = vmatmul.mubr.msk.f32.vlgmr.msra.gmra.mxu1 %vm27_vm0, %v430_v33 }
 0x498   :  { %652 = vmatpush1.msra.mxu1 %v2432_v34  ;;  %715 = vmatprep.mubr.f32.mxu1 %v3527_v27 }
 0x499   :  { %653 = vmatprep.subr.mxu1 %v2437_v35 }
 0x49a   :  { %654 = vmatpush1.msra.mxu1 %v2443_v36 }
 0x49b   :  { %655 = vmatprep.subr.mxu1 %v2450_v37 }
 0x49c   :  { %656 = vmatpush1.msra.mxu1 %v2456_v38 }
 0x49d   :  { %657 = vmatprep.subr.mxu1 %v2462_v39 }
 0x49e   :  { %658 = vmatpush1.msra.mxu1 %v2468_v40 }
 0x49f   :  { %659 = vmatprep.subr.mxu1 %v2474_v41 }
 0x4a0   :  { %660 = vmatpush1.msra.mxu1 %v2480_v42 }
 0x4a1   :  { %661 = vmatprep.subr.mxu1 %v2486_v43 }
 0x4a2   :  { %662 = vmatpush1.msra.mxu1 %v2492_v44 }
 0x4a3   :  { %663 = vmatprep.subr.mxu1 %v2498_v45 }
 0x4a4   :  { %664 = vmatpush1.msra.mxu1 %v2504_v46 }
 0x4a5   :  { %665 = vmatprep.subr.mxu1 %v2510_v47 }
 0x4a6   :  { %666 = vmatpush1.msra.mxu1 %v2516_v48 }
 0x4a7   :  { %667 = vmatprep.subr.mxu1 %v2522_v49 }
 0x4a8   :  { %668 = vmatpush1.msra.mxu1 %v2528_v50 }
 0x4a9   :  { %669 = vmatprep.subr.mxu1 %v2534_v51 }
 0x4aa   :  { %670 = vmatpush1.msra.mxu1 %v2540_v52 }
 0x4ab   :  { %671 = vmatprep.subr.mxu1 %v2546_v53 }
 0x4ac   :  { %672 = vmatpush1.msra.mxu1 %v2552_v54 }
 0x4ad   :  { %673 = vmatprep.subr.mxu1 %v2558_v55 }
 0x4ae   :  { %674 = vmatpush1.msra.mxu1 %v2564_v56 }
 0x4af   :  { %675 = vmatprep.subr.mxu1 %v2570_v57 }
 0x4b0   :  { %676 = vmatpush1.msra.mxu1 %v2576_v58 }
 0x4b1   :  { %677 = vmatprep.subr.mxu1 %v2582_v59 }
 0x4b2   :  { %678 = vmatpush1.msra.mxu1 %v2588_v60 }
 0x4b3   :  { %679 = vmatprep.subr.mxu1 %v2594_v61 }
 0x4b4   :  { %680 = vmatpush1.msra.mxu1 %v2606_v19 }
 0x4b5   :  { %681 = vmatprep.subr.mxu1 %v2612_v20 }
 0x4b6   :  { %682 = vmatpush1.msra.mxu1 %v2617_v22 }
 0x4b7   :  { %989 = vmatprep.subr.mxu1 %v2287_v0 }
 0x505   :  { %v433_v30 = vpop.permute.xlu0 %432 }
 0x506   :  { %v435_v16 = vsel %vm27_vm0, %v430_v33, %v433_v30  ;;  %v3531_v30 = vld [vmem:[#allocation8_spill] sm:$0xff] }
 0x507   :  { %501 = vmatmul.mubr.f32.vlgmr.msra.gmra.mxu0 %v435_v16 }
 0x508   :  { %775 = vmatpush1.msra.mxu0 %v2292_v1  ;;  %822 = vmatprep.mubr.f32.mxu0 %v3527_v27 }
 0x509   :  { %776 = vmatprep.subr.mxu0 %v2297_v2 }
 0x50a   :  { %777 = vmatpush1.msra.mxu0 %v2313_v4 }
 0x50b   :  { %778 = vmatprep.subr.mxu0 %v2319_v5 }
 0x50c   :  { %779 = vmatpush1.msra.mxu0 %v2325_v6 }
 0x50d   :  { %780 = vmatprep.subr.mxu0 %v2331_v7 }
 0x50e   :  { %781 = vmatpush1.msra.mxu0 %v2337_v8 }
 0x50f   :  { %782 = vmatprep.subr.mxu0 %v2343_v9 }
 0x510   :  { %783 = vmatpush1.msra.mxu0 %v2349_v10 }
 0x511   :  { %784 = vmatprep.subr.mxu0 %v2355_v11 }
 0x512   :  { %785 = vmatpush1.msra.mxu0 %v2361_v12 }
 0x513   :  { %786 = vmatprep.subr.mxu0 %v2367_v13 }
 0x514   :  { %787 = vmatpush1.msra.mxu0 %v2373_v14 }
 0x515   :  { %788 = vmatprep.subr.mxu0 %v3528_v21 }
 0x516   :  { %789 = vmatpush1.msra.mxu0 %v3529_v63 }
 0x517   :  { %866 = vmatprep.subr.mxu0 %v3530_v15 }
 0x557   :  { %v609_v62 = vpop.f32.mrf.mxu1 }
 0x558   :  { %v614_v23 = vadd.f32 %v1962_v18, %v609_v62  ;;  %v3532_v62 = vld [vmem:[#allocation9_spill] sm:$0xff] }
 0x559   :  { %v611_v31 = vpop.f32.mrf.mxu1 }
 0x55a   :  { %v615_v32 = vadd.f32 %v1963_v29, %v611_v31  ;;  %v1965_v25 = vmul.f32 -1.442695, %v614_v23 }
 0x55c   :  { %2043 = vtanh.f32 %v615_v32 }
 0x55d   :  { %2045 = vpow2.f32 %v1965_v25 }
 0x569   :  { %v2044_v17 = vpop.eup %2043 }
 0x56a   :  { %631 = vrot.lane.b32.xlu0 %v2044_v17, %s2248_s7  ;;  %v2046_v3 = vpop.eup %2045 }
 0x56b   :  { %v622_v15 = vadd.f32 1.0, %v2046_v3 }
 0x5c7   :  { %v502_v26 = vpop.f32.mrf.mxu0 }
 0x5c8   :  { %v503_v18 = vadd.f32 %v502_v26, %v3532_v62  ;;  %v1966_v26 = vmul.f32 -1.442695, %v615_v32 }
 0x5c9   :  { %v504_v33 = vpop.f32.mrf.mxu0 }
 0x5ca   :  { %v2774_v16 = vadd.f32 %v504_v33, %v3531_v30  ;;  %v1960_v23 = vmul.f32 -1.442695, %v503_v18 }
 0x5cc   :  { %2047 = vtanh.f32 %v2774_v16 }
 0x5cd   :  { %2049 = vrcp.f32 %v622_v15 }
 0x5ce   :  { %2051 = vpow2.f32 %v1960_v23 }
 0x5d9   :  { %v2048_v29 = vpop.eup %2047 }
 0x5da   :  { %522 = vrot.lane.b32.xlu1 %v2048_v29, %s2248_s7  ;;  %v2050_v31 = vpop.eup %2049 }
 0x5db   :  { %v2052_v25 = vpop.eup %2051  ;;  %v629_v15 = vmul.f32 %v2050_v31, %v2708_v28 }
 0x5dc   :  { %v632_v17 = vpop.permute.xlu0 %631  ;;  %v513_v21 = vadd.f32 1.0, %v2052_v25 }
 0x5dd   :  { %v634_v63 = vmul.f32 %v2050_v31, %v632_v17 }
 0x5de   :  { %2053 = vrcp.f32 %v513_v21 }
 0x5df   :  { %636 = vrot.lane.b32.xlu0 %v634_v63, %s2248_s7 }
 0x5eb   :  { %v2054_v33 = vpop.eup %2053 }
 0x5ec   :  { %v520_v21 = vmul.f32 %v2054_v33, %v2704_v24  ;;  %v1961_v24 = vmul.f32 -1.442695, %v2774_v16 }
 0x64c   :  { %v523_v3 = vpop.permute.xlu1 %522 }
 0x64d   :  { %v525_v30 = vmul.f32 %v2054_v33, %v523_v3 }
 0x64f   :  { %527 = vrot.lane.b32.xlu1 %v525_v30, %s2248_s7 }
 0x651   :  { %v637_v29 = vpop.permute.xlu0 %636 }
 0x652   :  { %v2782_v14 = vadd.f32 %v637_v29, %v629_v15 }
 0x654   :  { %2055 = vtanh.f32 %v2782_v14 }
 0x655   :  { %2057 = vpow2.f32 %v1966_v26 }
 0x661   :  { %v2056_v63 = vpop.eup %2055 }
 0x662   :  { %642 = vrot.lane.b32.xlu0 %v2056_v63, %s2248_s7  ;;  %v2058_v17 = vpop.eup %2057 }
 0x663   :  { %v623_v25 = vadd.f32 1.0, %v2058_v17  ;;  %v1970_v17 = vld [vmem:[%s3494_s0 + $0x38] sm:$0xff] }
 0x6c1   :  { %v528_v18 = vpop.permute.xlu1 %527 }
 0x6c2   :  { %v2787_v23 = vadd.f32 %v528_v18, %v520_v21 }
 0x6c4   :  { %2059 = vtanh.f32 %v2787_v23 }
 0x6c5   :  { %2061 = vrcp.f32 %v623_v25 }
 0x6c6   :  { %2063 = vpow2.f32 %v1961_v24 }
 0x6d1   :  { %v2060_v28 = vpop.eup %2059 }
 0x6d2   :  { %533 = vrot.lane.b32.xlu1 %v2060_v28, %s2248_s7  ;;  %v2062_v30 = vpop.eup %2061 }
 0x6d3   :  { %v2064_v32 = vpop.eup %2063 }
 0x6d4   :  { %v643_v31 = vpop.permute.xlu0 %642  ;;  %v514_v33 = vadd.f32 1.0, %v2064_v32 }
 0x6d5   :  { %v645_v3 = vmul.f32 %v2062_v30, %v643_v31  ;;  %v3537_v31 = vld [vmem:[#allocation8_spill] sm:$0xff] }
 0x6d6   :  { %2065 = vrcp.f32 %v514_v33 }
 0x6d7   :  { %1971 = vmatmul.mubr.msk.f32.vlgmr.msra.gmra.mxu0 %vm27_vm0, %v645_v3 }
 0x6d8   :  { %867 = vmatpush1.msra.mxu0 %v2432_v34  ;;  %930 = vmatprep.mubr.f32.mxu0 %v3527_v27 }
 0x6d9   :  { %868 = vmatprep.subr.mxu0 %v2437_v35 }
 0x6da   :  { %869 = vmatpush1.msra.mxu0 %v2443_v36 }
 0x6db   :  { %870 = vmatprep.subr.mxu0 %v2450_v37 }
 0x6dc   :  { %871 = vmatpush1.msra.mxu0 %v2456_v38 }
 0x6dd   :  { %872 = vmatprep.subr.mxu0 %v2462_v39 }
 0x6de   :  { %873 = vmatpush1.msra.mxu0 %v2468_v40 }
 0x6df   :  { %874 = vmatprep.subr.mxu0 %v2474_v41 }
 0x6e0   :  { %875 = vmatpush1.msra.mxu0 %v2480_v42 }
 0x6e1   :  { %876 = vmatprep.subr.mxu0 %v2486_v43 }
 0x6e2   :  { %877 = vmatpush1.msra.mxu0 %v2492_v44 }
 0x6e3   :  { %878 = vmatprep.subr.mxu0 %v2498_v45  ;;  %v2066_v15 = vpop.eup %2065 }
 0x6e4   :  { %879 = vmatpush1.msra.mxu0 %v2504_v46 }
 0x6e5   :  { %880 = vmatprep.subr.mxu0 %v2510_v47 }
 0x6e6   :  { %881 = vmatpush1.msra.mxu0 %v2516_v48 }
 0x6e7   :  { %882 = vmatprep.subr.mxu0 %v2522_v49 }
 0x6e8   :  { %883 = vmatpush1.msra.mxu0 %v2528_v50 }
 0x6e9   :  { %884 = vmatprep.subr.mxu0 %v2534_v51 }
 0x6ea   :  { %885 = vmatpush1.msra.mxu0 %v2540_v52 }
 0x6eb   :  { %886 = vmatprep.subr.mxu0 %v2546_v53 }
 0x6ec   :  { %887 = vmatpush1.msra.mxu0 %v2552_v54 }
 0x6ed   :  { %888 = vmatprep.subr.mxu0 %v2558_v55 }
 0x6ee   :  { %889 = vmatpush1.msra.mxu0 %v2564_v56 }
 0x6ef   :  { %890 = vmatprep.subr.mxu0 %v2570_v57 }
 0x6f0   :  { %891 = vmatpush1.msra.mxu0 %v2576_v58 }
 0x6f1   :  { %892 = vmatprep.subr.mxu0 %v2582_v59 }
 0x6f2   :  { %893 = vmatpush1.msra.mxu0 %v2588_v60 }
 0x6f3   :  { %894 = vmatprep.subr.mxu0 %v2594_v61 }
 0x6f4   :  { %895 = vmatpush1.msra.mxu0 %v2606_v19 }
 0x6f5   :  { %896 = vmatprep.subr.mxu0 %v2612_v20 }
 0x6f6   :  { %897 = vmatpush1.msra.mxu0 %v2617_v22 }
 0x6f7   :  { %1204 = vmatprep.subr.mxu0 %v2287_v0 }
 0x744   :  { %v534_v29 = vpop.permute.xlu1 %533 }
 0x745   :  { %v536_v63 = vmul.f32 %v2066_v15, %v534_v29 }
 0x747   :  { %647 = vrot.lane.b32.xlu1 %v536_v63, %s2248_s7 }
 0x797   :  { %v824_v26 = vpop.f32.mrf.mxu0 }
 0x799   :  { %v826_v21 = vpop.f32.mrf.mxu0 }
 0x79a   :  { %v830_v18 = vadd.f32 %v1970_v17, %v826_v21 }
 0x79c   :  { %2067 = vtanh.f32 %v830_v18  ;;  %v1973_v21 = vmul.f32 -1.442695, %v830_v18  ;;  %v2936_v18 = vld [vmem:[%s3493_s1 + $0x68] sm:$0xff] }
 0x7a9   :  { %v2068_v0 = vpop.eup %2067 }
 0x7aa   :  { %846 = vrot.lane.b32.xlu1 %v2068_v0, %s2248_s7 }
 0x7b9   :  { %v648_v16 = vpop.permute.xlu1 %647 }
 0x7ba   :  { %v650_v25 = vsel %vm27_vm0, %v645_v3, %v648_v16 }
 0x7bb   :  { %716 = vmatmul.mubr.f32.vlgmr.msra.gmra.mxu1 %v650_v25 }
 0x7bc   :  { %990 = vmatpush1.msra.mxu1 %v2292_v1  ;;  %1037 = vmatprep.mubr.f32.mxu1 %v3527_v27  ;;  %v3533_v1 = vld [vmem:[#allocation3_spill] sm:$0xff] }
 0x7bd   :  { %991 = vmatprep.subr.mxu1 %v2297_v2  ;;  %v3534_v2 = vld [vmem:[#allocation4_spill] sm:$0xff] }
 0x7be   :  { %992 = vmatpush1.msra.mxu1 %v2313_v4  ;;  %v3535_v4 = vld [vmem:[#allocation5_spill] sm:$0xff] }
 0x7bf   :  { %993 = vmatprep.subr.mxu1 %v2319_v5  ;;  %v3536_v5 = vld [vmem:[#allocation6_spill] sm:$0xff] }
 0x7c0   :  { %994 = vmatpush1.msra.mxu1 %v2325_v6  ;;  %v1969_v6 = vld [vmem:[%s3494_s0 + $0x30] sm:$0xff] }
 0x7c1   :  { %995 = vmatprep.subr.mxu1 %v2331_v7  ;;  %v829_v7 = vadd.f32 %v1969_v6, %v824_v26 }
 0x7c2   :  { %996 = vmatpush1.msra.mxu1 %v2337_v8 }
 0x7c3   :  { %997 = vmatprep.subr.mxu1 %v2343_v9  ;;  %v1972_v8 = vmul.f32 -1.442695, %v829_v7 }
 0x7c4   :  { %998 = vmatpush1.msra.mxu1 %v2349_v10 }
 0x7c5   :  { %999 = vmatprep.subr.mxu1 %v2355_v11  ;;  %2069 = vpow2.f32 %v1972_v8  ;;  %v2942_v8 = vld [vmem:[%s3493_s1 + $0x60] sm:$0xff] }
 0x7c6   :  { %1000 = vmatpush1.msra.mxu1 %v2361_v12 }
 0x7c7   :  { %1001 = vmatprep.subr.mxu1 %v2367_v13 }
 0x7c8   :  { %1002 = vmatpush1.msra.mxu1 %v3533_v1 }
 0x7c9   :  { %1003 = vmatprep.subr.mxu1 %v3534_v2 }
 0x7ca   :  { %1004 = vmatpush1.msra.mxu1 %v3535_v4 }
 0x7cb   :  { %1081 = vmatprep.subr.mxu1 %v3536_v5 }
 0x7d2   :  { %v2070_v9 = vpop.eup %2069 }
 0x7d3   :  { %v837_v10 = vadd.f32 1.0, %v2070_v9  ;;  %v2948_v9 = vld [vmem:[%s3493_s1 + $0x58] sm:$0xff] }
 0x7d5   :  { %2071 = vrcp.f32 %v837_v10  ;;  %v2955_v10 = vld [vmem:[%s3493_s1 + $0x50] sm:$0xff] }
 0x7e2   :  { %v2072_v11 = vpop.eup %2071 }
 0x7e3   :  { %v844_v32 = vmul.f32 %v2072_v11, %v2782_v14 }
 0x81c   :  { %v847_v12 = vpop.permute.xlu1 %846 }
 0x81d   :  { %v849_v13 = vmul.f32 %v2072_v11, %v847_v12  ;;  %v2961_v11 = vld [vmem:[%s3493_s1 + $0x48] sm:$0xff]  ;;  %v2967_v12 = vld [vmem:[%s3493_s1 + $0x40] sm:$0xff] }
 0x81f   :  { %851 = vrot.lane.b32.xlu1 %v849_v13, %s2248_s7  ;;  %v2973_v13 = vld [vmem:[%s3493_s1 + $0x38] sm:$0xff] }
 0x87b   :  { %v717_v28 = vpop.f32.mrf.mxu1 }
 0x87c   :  { %v718_v63 = vadd.f32 %v717_v28, %v3532_v62  ;;  %v2979_v28 = vld [vmem:[%s3493_s1 + $0x30] sm:$0xff] }
 0x87d   :  { %v719_v30 = vpop.f32.mrf.mxu1 }
 0x87e   :  { %v2854_v3 = vadd.f32 %v719_v30, %v3537_v31  ;;  %v1967_v26 = vmul.f32 -1.442695, %v718_v63  ;;  %v2985_v30 = vld [vmem:[%s3493_s1 + $0x28] sm:$0xff]  ;;  %v3021_v63 = vld [vmem:[%s3495_s2 + $0xf8] sm:$0xff] }
 0x880   :  { %2073 = vtanh.f32 %v2854_v3 }
 0x88d   :  { %v2074_v24 = vpop.eup %2073 }
 0x88e   :  { %737 = vrot.lane.b32.xlu0 %v2074_v24, %s2248_s7  ;;  %v2997_v24 = vld [vmem:[%s3493_s1 + $0x18] sm:$0xff] }
 0x891   :  { %v852_v33 = vpop.permute.xlu1 %851 }
 0x892   :  { %v2859_v15 = vadd.f32 %v852_v33, %v844_v32  ;;  %v3003_v32 = vld [vmem:[%s3493_s1 + $0x10] sm:$0xff]  ;;  %v3009_v33 = vld [vmem:[%s3493_s1 + $0x8] sm:$0xff] }
 0x894   :  { %2075 = vtanh.f32 %v2859_v15 }
 0x895   :  { %2077 = vpow2.f32 %v1967_v26 }
 0x896   :  { %2079 = vpow2.f32 %v1973_v21 }
 0x8a1   :  { %v2076_v29 = vpop.eup %2075 }
 0x8a2   :  { %857 = vrot.lane.b32.xlu1 %v2076_v29, %s2248_s7  ;;  %v2078_v17 = vpop.eup %2077  ;;  %v3015_v29 = vld [vmem:[%s3493_s1] sm:$0xff] }
 0x8a3   :  { %v728_v0 = vadd.f32 1.0, %v2078_v17  ;;  %v2080_v16 = vpop.eup %2079 }
 0x8a4   :  { %v838_v2 = vadd.f32 1.0, %v2080_v16 }
 0x8a5   :  { %2081 = vrcp.f32 %v728_v0 }
 0x8a6   :  { %2083 = vrcp.f32 %v838_v2 }
 0x8b2   :  { %v2082_v25 = vpop.eup %2081 }
 0x8b3   :  { %v2084_v4 = vpop.eup %2083 }
 0x900   :  { %v738_v14 = vpop.permute.xlu0 %737 }
 0x901   :  { %v740_v1 = vmul.f32 %v2082_v25, %v738_v14 }
 0x903   :  { %742 = vrot.lane.b32.xlu0 %v740_v1, %s2248_s7 }
 0x914   :  { %v858_v5 = vpop.permute.xlu1 %857 }
 0x915   :  { %v2865_v6 = vmul.f32 %v2084_v4, %v858_v5 }
 0x917   :  { %1978 = vmatmul.mubr.msk.f32.vlgmr.msra.gmra.mxu1 %vm27_vm0, %v2865_v6 }
 0x918   :  { %1082 = vmatpush1.msra.mxu1 %v2432_v34  ;;  %1145 = vmatprep.mubr.f32.mxu1 %v3527_v27  ;;  %v2904_v34 = vld [vmem:[%s3493_s1 + $0x78] sm:$0xff] }
 0x919   :  { %1083 = vmatprep.subr.mxu1 %v2437_v35  ;;  %v735_v35 = vmul.f32 %v2082_v25, %v2787_v23 }
 0x91a   :  { %1084 = vmatpush1.msra.mxu1 %v2443_v36 }
 0x91b   :  { %1085 = vmatprep.subr.mxu1 %v2450_v37 }
 0x91c   :  { %1086 = vmatpush1.msra.mxu1 %v2456_v38 }
 0x91d   :  { %1087 = vmatprep.subr.mxu1 %v2462_v39  ;;  %v1968_v39 = vmul.f32 -1.442695, %v2854_v3  ;;  %v2991_v3 = vld [vmem:[%s3493_s1 + $0x20] sm:$0xff] }
 0x91e   :  { %1088 = vmatpush1.msra.mxu1 %v2468_v40 }
 0x91f   :  { %1089 = vmatprep.subr.mxu1 %v2474_v41 }
 0x920   :  { %1090 = vmatpush1.msra.mxu1 %v2480_v42 }
 0x921   :  { %1091 = vmatprep.subr.mxu1 %v2486_v43  ;;  %v1977_v43 = vld [vmem:[%s3494_s0 + $0x48] sm:$0xff] }
 0x922   :  { %1092 = vmatpush1.msra.mxu1 %v2492_v44 }
 0x923   :  { %1093 = vmatprep.subr.mxu1 %v2498_v45 }
 0x924   :  { %1094 = vmatpush1.msra.mxu1 %v2504_v46 }
 0x925   :  { %1095 = vmatprep.subr.mxu1 %v2510_v47 }
 0x926   :  { %1096 = vmatpush1.msra.mxu1 %v2516_v48 }
 0x927   :  { %1097 = vmatprep.subr.mxu1 %v2522_v49 }
 0x928   :  { %1098 = vmatpush1.msra.mxu1 %v2528_v50  ;;  %v1976_v50 = vld [vmem:[%s3494_s0 + $0x40] sm:$0xff] }
 0x929   :  { %1099 = vmatprep.subr.mxu1 %v2534_v51 }
 0x92a   :  { %1100 = vmatpush1.msra.mxu1 %v2540_v52 }
 0x92b   :  { %1101 = vmatprep.subr.mxu1 %v2546_v53 }
 0x92c   :  { %1102 = vmatpush1.msra.mxu1 %v2552_v54 }
 0x92d   :  { %1103 = vmatprep.subr.mxu1 %v2558_v55 }
 0x92e   :  { %1104 = vmatpush1.msra.mxu1 %v2564_v56 }
 0x92f   :  { %1105 = vmatprep.subr.mxu1 %v2570_v57  ;;  %v2929_v57 = vld [vmem:[%s3493_s1 + $0x70] sm:$0xff] }
 0x930   :  { %1106 = vmatpush1.msra.mxu1 %v2576_v58 }
 0x931   :  { %1107 = vmatprep.subr.mxu1 %v2582_v59 }
 0x932   :  { %1108 = vmatpush1.msra.mxu1 %v2588_v60 }
 0x933   :  { %1109 = vmatprep.subr.mxu1 %v2594_v61 }
 0x934   :  { %1110 = vmatpush1.msra.mxu1 %v2606_v19 }
 0x935   :  { %1111 = vmatprep.subr.mxu1 %v2612_v20 }
 0x936   :  { %1112 = vmatpush1.msra.mxu1 %v2617_v22 }
 0x937   :  { %1419 = vmatprep.subr.mxu1 %v2904_v34 }
 0x975   :  { %v743_v36 = vpop.permute.xlu0 %742 }
 0x976   :  { %v2908_v37 = vadd.f32 %v743_v36, %v735_v35  ;;  %v3044_v36 = vld [vmem:[%s3495_s2 + $0xf0] sm:$0xff] }
 0x978   :  { %2085 = vtanh.f32 %v2908_v37 }
 0x979   :  { %2087 = vpow2.f32 %v1968_v39  ;;  %v3057_v39 = vld [vmem:[%s3495_s2 + $0xe0] sm:$0xff] }
 0x985   :  { %v2086_v38 = vpop.eup %2085 }
 0x986   :  { %748 = vrot.lane.b32.xlu0 %v2086_v38, %s2248_s7  ;;  %v2088_v40 = vpop.eup %2087  ;;  %v3051_v38 = vld [vmem:[%s3495_s2 + $0xe8] sm:$0xff] }
 0x987   :  { %v729_v42 = vadd.f32 1.0, %v2088_v40  ;;  %v3063_v40 = vld [vmem:[%s3495_s2 + $0xd8] sm:$0xff] }
 0x989   :  { %2089 = vrcp.f32 %v729_v42  ;;  %v3075_v42 = vld [vmem:[%s3495_s2 + $0xc8] sm:$0xff] }
 0x996   :  { %v2090_v46 = vpop.eup %2089 }
 0x9d7   :  { %v1039_v41 = vpop.f32.mrf.mxu1 }
 0x9d8   :  { %v1044_v51 = vadd.f32 %v1976_v50, %v1039_v41  ;;  %v3069_v41 = vld [vmem:[%s3495_s2 + $0xd0] sm:$0xff]  ;;  %v3123_v50 = vld [vmem:[%s3495_s2 + $0x88] sm:$0xff] }
 0x9d9   :  { %v1041_v44 = vpop.f32.mrf.mxu1 }
 0x9da   :  { %v2916_v45 = vadd.f32 %v1977_v43, %v1041_v44  ;;  %v1979_v52 = vmul.f32 -1.442695, %v1044_v51  ;;  %v3081_v43 = vld [vmem:[%s3495_s2 + $0xc0] sm:$0xff]  ;;  %v3087_v44 = vld [vmem:[%s3495_s2 + $0xb8] sm:$0xff] }
 0x9db   :  { %v3129_v51 = vld [vmem:[%s3495_s2 + $0x80] sm:$0xff] }
 0x9dc   :  { %2091 = vtanh.f32 %v2916_v45 }
 0x9dd   :  { %2093 = vpow2.f32 %v1979_v52  ;;  %v3135_v52 = vld [vmem:[%s3495_s2 + $0x78] sm:$0xff] }
 0x9e9   :  { %v2092_v49 = vpop.eup %2091 }
 0x9ea   :  { %v2094_v53 = vpop.eup %2093 }
 0x9eb   :  { %v1052_v54 = vadd.f32 1.0, %v2094_v53  ;;  %v3141_v53 = vld [vmem:[%s3495_s2 + $0x70] sm:$0xff] }
 0x9ed   :  { %2095 = vrcp.f32 %v1052_v54  ;;  %v3147_v54 = vld [vmem:[%s3495_s2 + $0x68] sm:$0xff] }
 0x9f8   :  { %v749_v47 = vpop.permute.xlu0 %748 }
 0x9f9   :  { %v751_v48 = vmul.f32 %v2090_v46, %v749_v47  ;;  %v3099_v46 = vld [vmem:[%s3495_s2 + $0xa8] sm:$0xff]  ;;  %v3105_v47 = vld [vmem:[%s3495_s2 + $0xa0] sm:$0xff] }
 0x9fa   :  { %v2096_v58 = vpop.eup %2095 }
 0x9fb   :  { %862 = vrot.lane.b32.xlu0 %v751_v48, %s2248_s7  ;;  %v1059_v26 = vmul.f32 %v2096_v58, %v2859_v15  ;;  %v1980_v15 = vmul.f32 -1.442695, %v2916_v45  ;;  %v3093_v45 = vld [vmem:[%s3495_s2 + $0xb0] sm:$0xff]  ;;  %v3111_v48 = vld [vmem:[%s3495_s2 + $0x98] sm:$0xff] }
 0x9ff   :  { %1061 = vrot.lane.b32.xlu0 %v2092_v49, %s2248_s7  ;;  %v3117_v49 = vld [vmem:[%s3495_s2 + $0x90] sm:$0xff] }
 0xa6d   :  { %v863_v55 = vpop.permute.xlu0 %862 }
 0xa6e   :  { %v865_v56 = vsel %vm27_vm0, %v2865_v6, %v863_v55  ;;  %v3153_v55 = vld [vmem:[%s3495_s2 + $0x60] sm:$0xff] }
 0xa6f   :  { %931 = vmatmul.mubr.f32.vlgmr.msra.gmra.mxu0 %v865_v56  ;;  %v3159_v56 = vld [vmem:[%s3495_s2 + $0x58] sm:$0xff] }
 0xa70   :  { %1205 = vmatpush1.msra.mxu0 %v2929_v57  ;;  %1252 = vmatprep.mubr.f32.mxu0 %v3527_v27 }
 0xa71   :  { %v1062_v23 = vpop.permute.xlu0 %1061  ;;  %1206 = vmatprep.subr.mxu0 %v2936_v18 }
 0xa72   :  { %v1064_v7 = vmul.f32 %v2096_v58, %v1062_v23  ;;  %1207 = vmatpush1.msra.mxu0 %v2942_v8  ;;  %v3165_v58 = vld [vmem:[%s3495_s2 + $0x50] sm:$0xff]  ;;  %v3171_v23 = vld [vmem:[%s3495_s2 + $0x48] sm:$0xff] }
 0xa73   :  { %1208 = vmatprep.subr.mxu0 %v2948_v9 }
 0xa74   :  { %1066 = vrot.lane.b32.xlu0 %v1064_v7, %s2248_s7  ;;  %1209 = vmatpush1.msra.mxu0 %v2955_v10  ;;  %v3177_v7 = vld [vmem:[%s3495_s2 + $0x40] sm:$0xff] }
 0xa75   :  { %1210 = vmatprep.subr.mxu0 %v2961_v11 }
 0xa76   :  { %1211 = vmatpush1.msra.mxu0 %v2967_v12 }
 0xa77   :  { %1212 = vmatprep.subr.mxu0 %v2973_v13 }
 0xa78   :  { %1213 = vmatpush1.msra.mxu0 %v2979_v28 }
 0xa79   :  { %1214 = vmatprep.subr.mxu0 %v2985_v30 }
 0xa7a   :  { %1215 = vmatpush1.msra.mxu0 %v2991_v3 }
 0xa7b   :  { %1216 = vmatprep.subr.mxu0 %v2997_v24 }
 0xa7c   :  { %1217 = vmatpush1.msra.mxu0 %v3003_v32 }
 0xa7d   :  { %1218 = vmatprep.subr.mxu0 %v3009_v33 }
 0xa7e   :  { %1219 = vmatpush1.msra.mxu0 %v3015_v29 }
 0xa7f   :  { %1296 = vmatprep.subr.mxu0 %v3021_v63 }
 0xae6   :  { %v1067_v17 = vpop.permute.xlu0 %1066 }
 0xae7   :  { %v3025_v21 = vadd.f32 %v1067_v17, %v1059_v26  ;;  %v3183_v26 = vld [vmem:[%s3495_s2 + $0x38] sm:$0xff]  ;;  %v3189_v17 = vld [vmem:[%s3495_s2 + $0x30] sm:$0xff] }
 0xae9   :  { %2097 = vtanh.f32 %v3025_v21 }
 0xaf6   :  { %v2098_v0 = vpop.eup %2097 }
 0xaf7   :  { %1072 = vrot.lane.b32.xlu0 %v2098_v0, %s2248_s7 }
 0xb2f   :  { %v3029_v16 = vpop.f32.mrf.mxu0 }
 0xb30   :  { %v933_v0 = vadd.f32 %v3029_v16, %v3532_v62 }
 0xb31   :  { %v934_v25 = vpop.f32.mrf.mxu0 }
 0xb32   :  { %v3032_v14 = vadd.f32 %v934_v25, %v3537_v31  ;;  %v1974_v25 = vmul.f32 -1.442695, %v933_v0 }
 0xb34   :  { %2099 = vtanh.f32 %v3032_v14 }
 0xb35   :  { %2101 = vpow2.f32 %v1980_v15 }
 0xb41   :  { %v2100_v1 = vpop.eup %2099 }
 0xb42   :  { %952 = vrot.lane.b32.xlu1 %v2100_v1, %s2248_s7  ;;  %v2102_v2 = vpop.eup %2101 }
 0xb43   :  { %v1053_v4 = vadd.f32 1.0, %v2102_v2 }
 0xb45   :  { %2103 = vrcp.f32 %v1053_v4 }
 0xb46   :  { %2105 = vpow2.f32 %v1974_v25 }
 0xb52   :  { %v2104_v5 = vpop.eup %2103 }
 0xb53   :  { %v2106_v1 = vpop.eup %2105 }
 0xb54   :  { %v943_v15 = vadd.f32 1.0, %v2106_v1 }
 0xb56   :  { %2107 = vrcp.f32 %v943_v15 }
 0xb69   :  { %v1073_v6 = vpop.permute.xlu0 %1072 }
 0xb6a   :  { %v3037_v35 = vmul.f32 %v2104_v5, %v1073_v6  ;;  %v1984_v6 = vld [vmem:[%s3494_s0 + $0x58] sm:$0xff] }
 0xb6c   :  { %1985 = vmatmul.mubr.msk.f32.vlgmr.msra.gmra.mxu0 %vm27_vm0, %v3037_v35 }
 0xb6d   :  { %1297 = vmatpush1.msra.mxu0 %v3044_v36  ;;  %1360 = vmatprep.mubr.f32.mxu0 %v3527_v27 }
 0xb6e   :  { %1298 = vmatprep.subr.mxu0 %v3051_v38 }
 0xb6f   :  { %1299 = vmatpush1.msra.mxu0 %v3057_v39 }
 0xb70   :  { %1300 = vmatprep.subr.mxu0 %v3063_v40 }
 0xb71   :  { %1301 = vmatpush1.msra.mxu0 %v3069_v41 }
 0xb72   :  { %1302 = vmatprep.subr.mxu0 %v3075_v42 }
 0xb73   :  { %1303 = vmatpush1.msra.mxu0 %v3081_v43 }
 0xb74   :  { %1304 = vmatprep.subr.mxu0 %v3087_v44 }
 0xb75   :  { %1305 = vmatpush1.msra.mxu0 %v3093_v45 }
 0xb76   :  { %1306 = vmatprep.subr.mxu0 %v3099_v46 }
 0xb77   :  { %1307 = vmatpush1.msra.mxu0 %v3105_v47 }
 0xb78   :  { %1308 = vmatprep.subr.mxu0 %v3111_v48 }
 0xb79   :  { %1309 = vmatpush1.msra.mxu0 %v3117_v49 }
 0xb7a   :  { %1310 = vmatprep.subr.mxu0 %v3123_v50 }
 0xb7b   :  { %1311 = vmatpush1.msra.mxu0 %v3129_v51 }
 0xb7c   :  { %1312 = vmatprep.subr.mxu0 %v3135_v52 }
 0xb7d   :  { %1313 = vmatpush1.msra.mxu0 %v3141_v53 }
 0xb7e   :  { %1314 = vmatprep.subr.mxu0 %v3147_v54 }
 0xb7f   :  { %1315 = vmatpush1.msra.mxu0 %v3153_v55 }
 0xb80   :  { %1316 = vmatprep.subr.mxu0 %v3159_v56 }
 0xb81   :  { %1317 = vmatpush1.msra.mxu0 %v3165_v58 }
 0xb82   :  { %1318 = vmatprep.subr.mxu0 %v3171_v23 }
 0xb83   :  { %1319 = vmatpush1.msra.mxu0 %v3177_v7 }
 0xb84   :  { %1320 = vmatprep.subr.mxu0 %v3183_v26 }
 0xb85   :  { %1321 = vmatpush1.msra.mxu0 %v3189_v17 }
 0xb86   :  { %1322 = vmatprep.subr.mxu0 %v2582_v59  ;;  %v2108_v59 = vpop.eup %2107 }
 0xb87   :  { %1323 = vmatpush1.msra.mxu0 %v2588_v60 }
 0xb88   :  { %1324 = vmatprep.subr.mxu0 %v2594_v61  ;;  %v950_v61 = vmul.f32 %v2108_v59, %v2908_v37 }
 0xb89   :  { %1325 = vmatpush1.msra.mxu0 %v2606_v19 }
 0xb8a   :  { %1326 = vmatprep.subr.mxu0 %v2612_v20 }
 0xb8b   :  { %1327 = vmatpush1.msra.mxu0 %v2617_v22 }
 0xb8c   :  { %1634 = vmatprep.subr.mxu0 %v2904_v34  ;;  %v1975_v34 = vmul.f32 -1.442695, %v3032_v14  ;;  %v1983_v14 = vld [vmem:[%s3494_s0 + $0x50] sm:$0xff] }
 0xbb4   :  { %v953_v60 = vpop.permute.xlu1 %952 }
 0xbb5   :  { %v955_v2 = vmul.f32 %v2108_v59, %v953_v60 }
 0xbb7   :  { %957 = vrot.lane.b32.xlu1 %v955_v2, %s2248_s7 }
 0xc29   :  { %v958_v19 = vpop.permute.xlu1 %957 }
 0xc2a   :  { %v3203_v20 = vadd.f32 %v958_v19, %v950_v61 }
 0xc2c   :  { %2109 = vtanh.f32 %v3203_v20  ;;  %v1254_v4 = vpop.f32.mrf.mxu0 }
 0xc2d   :  { %2111 = vpow2.f32 %v1975_v34  ;;  %v1259_v60 = vadd.f32 %v1983_v14, %v1254_v4 }
 0xc2e   :  { %v1256_v0 = vpop.f32.mrf.mxu0 }
 0xc2f   :  { %v1260_v37 = vadd.f32 %v1984_v6, %v1256_v0  ;;  %v1986_v2 = vmul.f32 -1.442695, %v1259_v60 }
 0xc31   :  { %v1987_v60 = vmul.f32 -1.442695, %v1260_v37 }
 0xc39   :  { %v2110_v22 = vpop.eup %2109 }
 0xc3a   :  { %963 = vrot.lane.b32.xlu1 %v2110_v22, %s2248_s7  ;;  %v2112_v16 = vpop.eup %2111 }
 0xc3b   :  { %v944_v5 = vadd.f32 1.0, %v2112_v16 }
 0xc3d   :  { %2113 = vrcp.f32 %v944_v5 }
 0xc3e   :  { %2115 = vtanh.f32 %v1260_v37  ;;  %v3279_v37 = vld [vmem:[%s3495_s2 + $0x28] sm:$0xff] }
 0xc3f   :  { %2117 = vpow2.f32 %v1986_v2 }
 0xc4a   :  { %v2114_v25 = vpop.eup %2113 }
 0xc4b   :  { %v2116_v59 = vpop.eup %2115 }
 0xc4c   :  { %v2118_v61 = vpop.eup %2117 }
 0xc4d   :  { %v1267_v19 = vadd.f32 1.0, %v2118_v61 }
 0xc4f   :  { %2119 = vrcp.f32 %v1267_v19 }
 0xc5c   :  { %v2120_v16 = vpop.eup %2119 }
 0xcac   :  { %v964_v1 = vpop.permute.xlu1 %963 }
 0xcad   :  { %v966_v15 = vmul.f32 %v2114_v25, %v964_v1 }
 0xcaf   :  { %1077 = vrot.lane.b32.xlu1 %v966_v15, %s2248_s7 }
 0xcb3   :  { %1276 = vrot.lane.b32.xlu1 %v2116_v59, %s2248_s7 }
 0xd21   :  { %v1078_v22 = vpop.permute.xlu1 %1077 }
 0xd22   :  { %v1080_v34 = vsel %vm27_vm0, %v3037_v35, %v1078_v22  ;;  %v1274_v35 = vmul.f32 %v2120_v16, %v3025_v21 }
 0xd23   :  { %1146 = vmatmul.mubr.f32.vlgmr.msra.gmra.mxu1 %v1080_v34  ;;  %v3285_v34 = vld [vmem:[%s3495_s2 + $0x20] sm:$0xff] }
 0xd24   :  { %1420 = vmatpush1.msra.mxu1 %v2929_v57  ;;  %1467 = vmatprep.mubr.f32.mxu1 %v3527_v27 }
 0xd25   :  { %v1277_v5 = vpop.permute.xlu1 %1276  ;;  %1421 = vmatprep.subr.mxu1 %v2936_v18 }
 0xd26   :  { %v1279_v6 = vmul.f32 %v2120_v16, %v1277_v5  ;;  %1422 = vmatpush1.msra.mxu1 %v2942_v8  ;;  %v3291_v16 = vld [vmem:[%s3495_s2 + $0x18] sm:$0xff]  ;;  %v3297_v5 = vld [vmem:[%s3495_s2 + $0x10] sm:$0xff] }
 0xd27   :  { %1423 = vmatprep.subr.mxu1 %v2948_v9 }
 0xd28   :  { %1281 = vrot.lane.b32.xlu1 %v1279_v6, %s2248_s7  ;;  %1424 = vmatpush1.msra.mxu1 %v2955_v10  ;;  %v3303_v6 = vld [vmem:[%s3495_s2 + $0x8] sm:$0xff] }
 0xd29   :  { %1425 = vmatprep.subr.mxu1 %v2961_v11  ;;  %3538 = vst [vmem:[#allocation9_spill] sm:$0xff] %v3303_v6 }
 0xd2a   :  { %1426 = vmatpush1.msra.mxu1 %v2967_v12 }
 0xd2b   :  { %1427 = vmatprep.subr.mxu1 %v2973_v13 }
 0xd2c   :  { %1428 = vmatpush1.msra.mxu1 %v2979_v28 }
 0xd2d   :  { %1429 = vmatprep.subr.mxu1 %v2985_v30 }
 0xd2e   :  { %1430 = vmatpush1.msra.mxu1 %v2991_v3 }
 0xd2f   :  { %1431 = vmatprep.subr.mxu1 %v2997_v24 }
 0xd30   :  { %1432 = vmatpush1.msra.mxu1 %v3003_v32 }
 0xd31   :  { %1433 = vmatprep.subr.mxu1 %v3009_v33 }
 0xd32   :  { %1434 = vmatpush1.msra.mxu1 %v3015_v29 }
 0xd33   :  { %1511 = vmatprep.subr.mxu1 %v3021_v63 }
 0xd9a   :  { %v1282_v4 = vpop.permute.xlu1 %1281 }
 0xd9b   :  { %v3237_v0 = vadd.f32 %v1282_v4, %v1274_v35  ;;  %v3309_v35 = vld [vmem:[%s3495_s2] sm:$0xff] }
 0xd9c   :  { %3539 = vst [vmem:[#allocation3_spill] sm:$0xff] %v3309_v35 }
 0xd9d   :  { %2121 = vtanh.f32 %v3237_v0 }
 0xdaa   :  { %v2122_v25 = vpop.eup %2121 }
 0xdab   :  { %1287 = vrot.lane.b32.xlu1 %v2122_v25, %s2248_s7 }
 0xde3   :  { %v1147_v1 = vpop.f32.mrf.mxu1 }
 0xde4   :  { %v1148_v4 = vadd.f32 %v1147_v1, %v3532_v62 }
 0xde5   :  { %v1149_v15 = vpop.f32.mrf.mxu1 }
 0xde6   :  { %v3242_v59 = vadd.f32 %v1149_v15, %v3537_v31  ;;  %v1981_v25 = vmul.f32 -1.442695, %v1148_v4 }
 0xde8   :  { %2123 = vtanh.f32 %v3242_v59  ;;  %v1982_v1 = vmul.f32 -1.442695, %v3242_v59  ;;  %v1990_v59 = vld [vmem:[%s3494_s0 + $0x60] sm:$0xff] }
 0xde9   :  { %2125 = vpow2.f32 %v1987_v60 }
 0xdf5   :  { %v2124_v14 = vpop.eup %2123 }
 0xdf6   :  { %1167 = vrot.lane.b32.xlu0 %v2124_v14, %s2248_s7  ;;  %v2126_v21 = vpop.eup %2125 }
 0xdf7   :  { %v1268_v2 = vadd.f32 1.0, %v2126_v21 }
 0xdf9   :  { %2127 = vrcp.f32 %v1268_v2 }
 0xdfa   :  { %2129 = vpow2.f32 %v1981_v25 }
 0xe06   :  { %v2128_v61 = vpop.eup %2127 }
 0xe07   :  { %v2130_v15 = vpop.eup %2129 }
 0xe08   :  { %v1158_v14 = vadd.f32 1.0, %v2130_v15 }
 0xe0a   :  { %2131 = vrcp.f32 %v1158_v14  ;;  %v1991_v14 = vld [vmem:[%s3494_s0 + $0x68] sm:$0xff] }
 0xe17   :  { %v2132_v60 = vpop.eup %2131 }
 0xe1d   :  { %v1288_v19 = vpop.permute.xlu1 %1287 }
 0xe1e   :  { %v3246_v22 = vmul.f32 %v2128_v61, %v1288_v19  ;;  %v1165_v61 = vmul.f32 %v2132_v60, %v3203_v20 }
 0xe20   :  { %1992 = vmatmul.mubr.msk.f32.vlgmr.msra.gmra.mxu1 %vm27_vm0, %v3246_v22 }
 0xe21   :  { %1512 = vmatpush1.msra.mxu1 %v3044_v36  ;;  %1575 = vmatprep.mubr.f32.mxu1 %v3527_v27 }
 0xe22   :  { %1513 = vmatprep.subr.mxu1 %v3051_v38 }
 0xe23   :  { %1514 = vmatpush1.msra.mxu1 %v3057_v39 }
 0xe24   :  { %1515 = vmatprep.subr.mxu1 %v3063_v40 }
 0xe25   :  { %1516 = vmatpush1.msra.mxu1 %v3069_v41 }
 0xe26   :  { %1517 = vmatprep.subr.mxu1 %v3075_v42 }
 0xe27   :  { %1518 = vmatpush1.msra.mxu1 %v3081_v43 }
 0xe28   :  { %1519 = vmatprep.subr.mxu1 %v3087_v44 }
 0xe29   :  { %1520 = vmatpush1.msra.mxu1 %v3093_v45 }
 0xe2a   :  { %1521 = vmatprep.subr.mxu1 %v3099_v46 }
 0xe2b   :  { %1522 = vmatpush1.msra.mxu1 %v3105_v47 }
 0xe2c   :  { %1523 = vmatprep.subr.mxu1 %v3111_v48 }
 0xe2d   :  { %1524 = vmatpush1.msra.mxu1 %v3117_v49 }
 0xe2e   :  { %1525 = vmatprep.subr.mxu1 %v3123_v50 }
 0xe2f   :  { %1526 = vmatpush1.msra.mxu1 %v3129_v51 }
 0xe30   :  { %1527 = vmatprep.subr.mxu1 %v3135_v52 }
 0xe31   :  { %1528 = vmatpush1.msra.mxu1 %v3141_v53 }
 0xe32   :  { %1529 = vmatprep.subr.mxu1 %v3147_v54 }
 0xe33   :  { %1530 = vmatpush1.msra.mxu1 %v3153_v55 }
 0xe34   :  { %1531 = vmatprep.subr.mxu1 %v3159_v56 }
 0xe35   :  { %1532 = vmatpush1.msra.mxu1 %v3165_v58 }
 0xe36   :  { %1533 = vmatprep.subr.mxu1 %v3171_v23 }
 0xe37   :  { %1534 = vmatpush1.msra.mxu1 %v3177_v7 }
 0xe38   :  { %1535 = vmatprep.subr.mxu1 %v3183_v26 }
 0xe39   :  { %1536 = vmatpush1.msra.mxu1 %v3189_v17 }
 0xe3a   :  { %1537 = vmatprep.subr.mxu1 %v3279_v37 }
 0xe3b   :  { %1538 = vmatpush1.msra.mxu1 %v3285_v34 }
 0xe3c   :  { %1539 = vmatprep.subr.mxu1 %v3291_v16 }
 0xe3d   :  { %1540 = vmatpush1.msra.mxu1 %v3297_v5 }
 0xe3e   :  { %1541 = vmatprep.subr.mxu1 %v3303_v6 }
 0xe3f   :  { %1542 = vmatpush1.msra.mxu1 %v3309_v35 }
 0xe68   :  { %v1168_v21 = vpop.permute.xlu0 %1167 }
 0xe69   :  { %v1170_v2 = vmul.f32 %v2132_v60, %v1168_v21 }
 0xe6b   :  { %1172 = vrot.lane.b32.xlu0 %v1170_v2, %s2248_s7 }
 0xedd   :  { %v1173_v19 = vpop.permute.xlu0 %1172 }
 0xede   :  { %v3315_v6 = vadd.f32 %v1173_v19, %v1165_v61 }
 0xee0   :  { %3540 = vst [vmem:[#allocation4_spill] sm:$0xff] %v3315_v6  ;;  %2133 = vtanh.f32 %v3315_v6  ;;  %v1469_v25 = vpop.f32.mrf.mxu1 }
 0xee1   :  { %2135 = vpow2.f32 %v1982_v1  ;;  %v1474_v19 = vadd.f32 %v1990_v59, %v1469_v25 }
 0xee2   :  { %v1471_v21 = vpop.f32.mrf.mxu1 }
 0xee3   :  { %v1475_v20 = vadd.f32 %v1991_v14, %v1471_v21  ;;  %v1993_v1 = vmul.f32 -1.442695, %v1474_v19 }
 0xeed   :  { %v2134_v35 = vpop.eup %2133 }
 0xeee   :  { %1178 = vrot.lane.b32.xlu0 %v2134_v35, %s2248_s7  ;;  %v2136_v4 = vpop.eup %2135 }
 0xeef   :  { %v1159_v15 = vadd.f32 1.0, %v2136_v4 }
 0xef1   :  { %2137 = vrcp.f32 %v1159_v15 }
 0xef2   :  { %2139 = vtanh.f32 %v1475_v20 }
 0xef3   :  { %2141 = vpow2.f32 %v1993_v1 }
 0xefe   :  { %v2138_v60 = vpop.eup %2137 }
 0xeff   :  { %v2140_v35 = vpop.eup %2139 }
 0xf00   :  { %v2142_v4 = vpop.eup %2141 }
 0xf01   :  { %v1482_v6 = vadd.f32 1.0, %v2142_v4 }
 0xf03   :  { %2143 = vrcp.f32 %v1482_v6 }
 0xf10   :  { %v2144_v21 = vpop.eup %2143 }
 0xf60   :  { %v1179_v2 = vpop.permute.xlu0 %1178 }
 0xf61   :  { %v1181_v61 = vmul.f32 %v2138_v60, %v1179_v2 }
 0xf63   :  { %1292 = vrot.lane.b32.xlu0 %v1181_v61, %s2248_s7 }
 0xf67   :  { %1491 = vrot.lane.b32.xlu0 %v2140_v35, %s2248_s7 }
 0xfd5   :  { %v1293_v15 = vpop.permute.xlu0 %1292 }
 0xfd6   :  { %v1295_v14 = vsel %vm27_vm0, %v3246_v22, %v1293_v15 }
 0xfd7   :  { %1361 = vmatmul.mubr.f32.vlgmr.msra.gmra.mxu0 %v1295_v14 }
 0xfd8   :  { %1635 = vmatpush1.msra.mxu0 %v2929_v57  ;;  %1682 = vmatprep.mubr.f32.mxu0 %v3527_v27  ;;  %v1489_v57 = vmul.f32 %v2144_v21, %v3237_v0 }
 0xfd9   :  { %v1492_v60 = vpop.permute.xlu0 %1491  ;;  %1636 = vmatprep.subr.mxu0 %v2936_v18 }
 0xfda   :  { %v1494_v2 = vmul.f32 %v2144_v21, %v1492_v60  ;;  %1637 = vmatpush1.msra.mxu0 %v2942_v8 }
 0xfdb   :  { %1638 = vmatprep.subr.mxu0 %v2948_v9 }
 0xfdc   :  { %1496 = vrot.lane.b32.xlu0 %v1494_v2, %s2248_s7  ;;  %1639 = vmatpush1.msra.mxu0 %v2955_v10 }
 0xfdd   :  { %1640 = vmatprep.subr.mxu0 %v2961_v11 }
 0xfde   :  { %1641 = vmatpush1.msra.mxu0 %v2967_v12 }
 0xfdf   :  { %1642 = vmatprep.subr.mxu0 %v2973_v13 }
 0xfe0   :  { %1643 = vmatpush1.msra.mxu0 %v2979_v28  ;;  %v1994_v28 = vmul.f32 -1.442695, %v1475_v20 }
 0xfe1   :  { %1644 = vmatprep.subr.mxu0 %v2985_v30 }
 0xfe2   :  { %1645 = vmatpush1.msra.mxu0 %v2991_v3 }
 0xfe3   :  { %1646 = vmatprep.subr.mxu0 %v2997_v24 }
 0xfe4   :  { %1647 = vmatpush1.msra.mxu0 %v3003_v32 }
 0xfe5   :  { %1648 = vmatprep.subr.mxu0 %v3009_v33 }
 0xfe6   :  { %1649 = vmatpush1.msra.mxu0 %v3015_v29  ;;  %v3541_v29 = vld [vmem:[#allocation9_spill] sm:$0xff] }
 0xfe7   :  { %1726 = vmatprep.subr.mxu0 %v3021_v63  ;;  %v3542_v63 = vld [vmem:[#allocation3_spill] sm:$0xff] }
0x104e   :  { %v1497_v18 = vpop.permute.xlu0 %1496 }
0x104f   :  { %v3349_v8 = vadd.f32 %v1497_v18, %v1489_v57 }
0x1051   :  { %2145 = vtanh.f32 %v3349_v8 }
0x105e   :  { %v2146_v9 = vpop.eup %2145 }
0x105f   :  { %1502 = vrot.lane.b32.xlu0 %v2146_v9, %s2248_s7 }
0x1097   :  { %v1362_v10 = vpop.f32.mrf.mxu0 }
0x1099   :  { %v1364_v11 = vpop.f32.mrf.mxu0 }
0x109a   :  { %v1365_v12 = vadd.f32 %v1364_v11, %v3537_v31 }
0x109c   :  { %2147 = vtanh.f32 %v1365_v12 }
0x109d   :  { %2149 = vpow2.f32 %v1994_v28 }
0x10a9   :  { %v2148_v13 = vpop.eup %2147 }
0x10aa   :  { %1382 = vrot.lane.b32.xlu1 %v2148_v13, %s2248_s7  ;;  %v2150_v30 = vpop.eup %2149 }
0x10ab   :  { %v1483_v3 = vadd.f32 1.0, %v2150_v30 }
0x10ad   :  { %2151 = vrcp.f32 %v1483_v3 }
0x10ba   :  { %v2152_v24 = vpop.eup %2151 }
0x10d1   :  { %v1503_v32 = vpop.permute.xlu0 %1502 }
0x10d2   :  { %v3355_v33 = vmul.f32 %v2152_v24, %v1503_v32 }
0x10d4   :  { %1999 = vmatmul.mubr.msk.f32.vlgmr.msra.gmra.mxu0 %vm27_vm0, %v3355_v33 }
0x10d5   :  { %1727 = vmatpush1.msra.mxu0 %v3044_v36  ;;  %1790 = vmatprep.mubr.f32.mxu0 %v3527_v27  ;;  %v1363_v36 = vadd.f32 %v1362_v10, %v3532_v62 }
0x10d6   :  { %1728 = vmatprep.subr.mxu0 %v3051_v38 }
0x10d7   :  { %1729 = vmatpush1.msra.mxu0 %v3057_v39  ;;  %v1988_v38 = vmul.f32 -1.442695, %v1363_v36 }
0x10d8   :  { %1730 = vmatprep.subr.mxu0 %v3063_v40 }
0x10d9   :  { %1731 = vmatpush1.msra.mxu0 %v3069_v41  ;;  %2153 = vpow2.f32 %v1988_v38 }
0x10da   :  { %1732 = vmatprep.subr.mxu0 %v3075_v42 }
0x10db   :  { %1733 = vmatpush1.msra.mxu0 %v3081_v43 }
0x10dc   :  { %1734 = vmatprep.subr.mxu0 %v3087_v44  ;;  %v3543_v44 = vld [vmem:[#allocation4_spill] sm:$0xff] }
0x10dd   :  { %1735 = vmatpush1.msra.mxu0 %v3093_v45 }
0x10de   :  { %1736 = vmatprep.subr.mxu0 %v3099_v46 }
0x10df   :  { %1737 = vmatpush1.msra.mxu0 %v3105_v47 }
0x10e0   :  { %1738 = vmatprep.subr.mxu0 %v3111_v48 }
0x10e1   :  { %1739 = vmatpush1.msra.mxu0 %v3117_v49  ;;  %v1989_v49 = vmul.f32 -1.442695, %v1365_v12 }
0x10e2   :  { %1740 = vmatprep.subr.mxu0 %v3123_v50 }
0x10e3   :  { %1741 = vmatpush1.msra.mxu0 %v3129_v51 }
0x10e4   :  { %1742 = vmatprep.subr.mxu0 %v3135_v52 }
0x10e5   :  { %1743 = vmatpush1.msra.mxu0 %v3141_v53  ;;  %v1998_v53 = vld [vmem:[%s3494_s0 + $0x78] sm:$0xff] }
0x10e6   :  { %1744 = vmatprep.subr.mxu0 %v3147_v54  ;;  %v2154_v39 = vpop.eup %2153 }
0x10e7   :  { %1745 = vmatpush1.msra.mxu0 %v3153_v55  ;;  %v1373_v40 = vadd.f32 1.0, %v2154_v39 }
0x10e8   :  { %1746 = vmatprep.subr.mxu0 %v3159_v56 }
0x10e9   :  { %1747 = vmatpush1.msra.mxu0 %v3165_v58  ;;  %2155 = vrcp.f32 %v1373_v40 }
0x10ea   :  { %1748 = vmatprep.subr.mxu0 %v3171_v23 }
0x10eb   :  { %1749 = vmatpush1.msra.mxu0 %v3177_v7 }
0x10ec   :  { %1750 = vmatprep.subr.mxu0 %v3183_v26  ;;  %v1997_v26 = vld [vmem:[%s3494_s0 + $0x70] sm:$0xff] }
0x10ed   :  { %1751 = vmatpush1.msra.mxu0 %v3189_v17 }
0x10ee   :  { %1752 = vmatprep.subr.mxu0 %v3279_v37 }
0x10ef   :  { %1753 = vmatpush1.msra.mxu0 %v3285_v34 }
0x10f0   :  { %1754 = vmatprep.subr.mxu0 %v3291_v16 }
0x10f1   :  { %1755 = vmatpush1.msra.mxu0 %v3297_v5 }
0x10f2   :  { %1756 = vmatprep.subr.mxu0 %v3541_v29 }
0x10f3   :  { %1757 = vmatpush1.msra.mxu0 %v3542_v63 }
0x10f6   :  { %v2156_v41 = vpop.eup %2155 }
0x10f7   :  { %v1380_v45 = vmul.f32 %v2156_v41, %v3543_v44 }
0x111c   :  { %v1383_v42 = vpop.permute.xlu1 %1382 }
0x111d   :  { %v1385_v43 = vmul.f32 %v2156_v41, %v1383_v42 }
0x111f   :  { %1387 = vrot.lane.b32.xlu1 %v1385_v43, %s2248_s7 }
0x1191   :  { %v1388_v46 = vpop.permute.xlu1 %1387 }
0x1192   :  { %v3394_v47 = vadd.f32 %v1388_v46, %v1380_v45 }
0x1194   :  { %2157 = vtanh.f32 %v3394_v47  ;;  %v1684_v51 = vpop.f32.mrf.mxu0 }
0x1195   :  { %2159 = vpow2.f32 %v1989_v49  ;;  %v1689_v17 = vadd.f32 %v1997_v26, %v1684_v51  ;;  %v1847_v26 = vld [vmem:[%s3497_s4 + $0x28] sm:$0xff] }
0x1196   :  { %v1686_v54 = vpop.f32.mrf.mxu0 }
0x1197   :  { %v1690_v55 = vadd.f32 %v1998_v53, %v1686_v54  ;;  %v2000_v0 = vmul.f32 -1.442695, %v1689_v17  ;;  %v1854_v53 = vld [vmem:[%s3497_s4 + $0x60] sm:$0xff]  ;;  %v1853_v54 = vld [vmem:[%s3497_s4 + $0x58] sm:$0xff] }
0x1198   :  { %v1846_v17 = vld [vmem:[%s3497_s4 + $0x20] sm:$0xff] }
0x11a1   :  { %v2158_v48 = vpop.eup %2157 }
0x11a2   :  { %1393 = vrot.lane.b32.xlu1 %v2158_v48, %s2248_s7  ;;  %v2160_v50 = vpop.eup %2159 }
0x11a3   :  { %v1374_v52 = vadd.f32 1.0, %v2160_v50 }
0x11a5   :  { %2161 = vrcp.f32 %v1374_v52  ;;  %v1855_v52 = vld [vmem:[%s3497_s4 + $0x68] sm:$0xff] }
0x11a6   :  { %2163 = vtanh.f32 %v1690_v55 }
0x11a7   :  { %2165 = vpow2.f32 %v2000_v0  ;;  %v1845_v0 = vld [vmem:[%s3497_s4 + $0x18] sm:$0xff] }
0x11b2   :  { %v2162_v56 = vpop.eup %2161 }
0x11b3   :  { %v2164_v7 = vpop.eup %2163 }
0x11b4   :  { %v2166_v22 = vpop.eup %2165 }
0x11b5   :  { %v1697_v37 = vadd.f32 1.0, %v2166_v22  ;;  %v1844_v22 = vld [vmem:[%s3497_s4 + $0x10] sm:$0xff] }
0x11b7   :  { %2167 = vrcp.f32 %v1697_v37 }
0x11c4   :  { %v2168_v5 = vpop.eup %2167 }
0x11c5   :  { %v1704_v20 = vmul.f32 %v2168_v5, %v3349_v8 }
0x1214   :  { %v1394_v58 = vpop.permute.xlu1 %1393 }
0x1215   :  { %v1396_v23 = vmul.f32 %v2162_v56, %v1394_v58  ;;  %v1851_v56 = vld [vmem:[%s3497_s4 + $0x48] sm:$0xff]  ;;  %v1850_v58 = vld [vmem:[%s3497_s4 + $0x40] sm:$0xff] }
0x1217   :  { %1507 = vrot.lane.b32.xlu1 %v1396_v23, %s2248_s7  ;;  %v1849_v23 = vld [vmem:[%s3497_s4 + $0x38] sm:$0xff] }
0x121b   :  { %1706 = vrot.lane.b32.xlu1 %v2164_v7, %s2248_s7  ;;  %v1848_v7 = vld [vmem:[%s3497_s4 + $0x30] sm:$0xff] }
0x1289   :  { %v1508_v34 = vpop.permute.xlu1 %1507 }
0x128a   :  { %v1510_v16 = vsel %vm27_vm0, %v3355_v33, %v1508_v34 }
0x128b   :  { %1576 = vmatmul.mubr.f32.vlgmr.msra.gmra.mxu1 %v1510_v16 }
0x128c   :  { %1937 = vmatprep.mubr.f32.mxu1 %v3527_v27  ;;  %v2001_v27 = vmul.f32 -1.442695, %v1690_v55  ;;  %v1852_v55 = vld [vmem:[%s3497_s4 + $0x50] sm:$0xff] }
0x128d   :  { %v1707_v6 = vpop.permute.xlu1 %1706 }
0x128e   :  { %v1709_v25 = vmul.f32 %v2168_v5, %v1707_v6  ;;  %v1843_v5 = vld [vmem:[%s3497_s4 + $0x8] sm:$0xff] }
0x1290   :  { %1711 = vrot.lane.b32.xlu1 %v1709_v25, %s2248_s7  ;;  %v1842_v25 = vld [vmem:[%s3497_s4] sm:$0xff] }
0x1302   :  { %v1712_v61 = vpop.permute.xlu1 %1711 }
0x1303   :  { %v1714_v35 = vadd.f32 %v1712_v61, %v1704_v20 }
0x1305   :  { %2169 = vtanh.f32 %v1714_v35 }
0x1312   :  { %v2170_v59 = vpop.eup %2169 }
0x1313   :  { %1717 = vrot.lane.b32.xlu1 %v2170_v59, %s2248_s7 }
0x134b   :  { %v1577_v19 = vpop.f32.mrf.mxu1 }
0x134c   :  { %v1578_v18 = vadd.f32 %v1577_v19, %v3532_v62 }
0x134d   :  { %v1579_v1 = vpop.f32.mrf.mxu1 }
0x134e   :  { %v1580_v4 = vadd.f32 %v1579_v1, %v3537_v31  ;;  %v1995_v8 = vmul.f32 -1.442695, %v1578_v18 }
0x1350   :  { %2171 = vtanh.f32 %v1580_v4  ;;  %v1996_v32 = vmul.f32 -1.442695, %v1580_v4 }
0x1351   :  { %2173 = vpow2.f32 %v2001_v27  ;;  %v1858_v27 = vld [vmem:[%s3498_s5] sm:$0x3] }
0x135d   :  { %v2172_v15 = vpop.eup %2171 }
0x135e   :  { %1597 = vrot.lane.b32.xlu0 %v2172_v15, %s2248_s7  ;;  %v2174_v14 = vpop.eup %2173 }
0x135f   :  { %v1698_v21 = vadd.f32 1.0, %v2174_v14  ;;  %v3544_v14 = vld [vmem:[#allocation7_spill] sm:$0xff] }
0x1361   :  { %2175 = vrcp.f32 %v1698_v21  ;;  %v3545_v21 = vsub.s32 0, %v3544_v14 }
0x1362   :  { %2177 = vpow2.f32 %v1995_v8 }
0x136e   :  { %v2176_v60 = vpop.eup %2175 }
0x136f   :  { %v2178_v9 = vpop.eup %2177 }
0x1370   :  { %v1588_v10 = vadd.f32 1.0, %v2178_v9 }
0x1372   :  { %2179 = vrcp.f32 %v1588_v10 }
0x137f   :  { %v2180_v11 = vpop.eup %2179 }
0x1380   :  { %v1595_v28 = vmul.f32 %v2180_v11, %v3394_v47 }
0x1385   :  { %v1718_v2 = vpop.permute.xlu1 %1717 }
0x1386   :  { %v1720_v57 = vmul.f32 %v2176_v60, %v1718_v2  ;;  %v1863_v60 = vrot.slane %v1858_v27, %v3545_v21  ;;  %v3546_v2 = vsub.s32 1, %v3544_v14 }
0x1388   :  { %1827 = vst.msk [vmem:[#allocation2] sm:$0xff] %vm27_vm0, %v1720_v57 }
0x13d0   :  { %v1598_v12 = vpop.permute.xlu0 %1597 }
0x13d1   :  { %v1600_v13 = vmul.f32 %v2180_v11, %v1598_v12 }
0x13d3   :  { %1602 = vrot.lane.b32.xlu0 %v1600_v13, %s2248_s7 }
0x1445   :  { %v1603_v30 = vpop.permute.xlu0 %1602 }
0x1446   :  { %v1605_v3 = vadd.f32 %v1603_v30, %v1595_v28 }
0x1448   :  { %2181 = vtanh.f32 %v1605_v3 }
0x1449   :  { %2183 = vpow2.f32 %v1996_v32 }
0x1455   :  { %v2182_v24 = vpop.eup %2181 }
0x1456   :  { %1608 = vrot.lane.b32.xlu0 %v2182_v24, %s2248_s7  ;;  %v2184_v33 = vpop.eup %2183 }
0x1457   :  { %v1589_v29 = vadd.f32 1.0, %v2184_v33 }
0x1459   :  { %2185 = vrcp.f32 %v1589_v29 }
0x1466   :  { %v2186_v63 = vpop.eup %2185 }
0x14c8   :  { %v1609_v36 = vpop.permute.xlu0 %1608 }
0x14c9   :  { %v1611_v38 = vmul.f32 %v2186_v63, %v1609_v36 }
0x14cb   :  { %1722 = vrot.lane.b32.xlu0 %v1611_v38, %s2248_s7 }
0x153d   :  { %v1723_v39 = vpop.permute.xlu0 %1722 }
0x153e   :  { %v1725_v40 = vsel %vm27_vm0, %v1720_v57, %v1723_v39  ;;  %v1867_v57 = vrot.slane %v1858_v27, %v3546_v2 }
0x153f   :  { %1791 = vmatmul.mubr.f32.vlgmr.msra.gmra.mxu0 %v1725_v40 }
0x15ff   :  { %v1792_v41 = vpop.f32.mrf.mxu0 }
0x1600   :  { %v1793_v45 = vadd.f32 %v1792_v41, %v3532_v62  ;;  %v1856_v62 = vld [vmem:[%s3497_s4 + $0x70] sm:$0xff] }
0x1601   :  { %v1794_v42 = vpop.f32.mrf.mxu0 }
0x1602   :  { %v1795_v43 = vadd.f32 %v1794_v42, %v3537_v31  ;;  %v2002_v46 = vmul.f32 -1.442695, %v1793_v45  ;;  %v1857_v31 = vld [vmem:[%s3497_s4 + $0x78] sm:$0xff] }
0x1603   :  { %1889 = vmatprep.subr.mxu1 %v1857_v31 }
0x1604   :  { %2187 = vtanh.f32 %v1795_v43  ;;  %1890 = vmatpush1.msra.mxu1 %v1856_v62  ;;  %v2003_v61 = vmul.f32 -1.442695, %v1795_v43 }
0x1605   :  { %2189 = vpow2.f32 %v2002_v46  ;;  %1891 = vmatprep.subr.mxu1 %v1855_v52 }
0x1606   :  { %1892 = vmatpush1.msra.mxu1 %v1854_v53 }
0x1607   :  { %1893 = vmatprep.subr.mxu1 %v1853_v54 }
0x1608   :  { %1894 = vmatpush1.msra.mxu1 %v1852_v55 }
0x1609   :  { %1895 = vmatprep.subr.mxu1 %v1851_v56 }
0x160a   :  { %1896 = vmatpush1.msra.mxu1 %v1850_v58 }
0x160b   :  { %1897 = vmatprep.subr.mxu1 %v1849_v23 }
0x160c   :  { %1898 = vmatpush1.msra.mxu1 %v1848_v7 }
0x160d   :  { %1899 = vmatprep.subr.mxu1 %v1847_v26 }
0x160e   :  { %1900 = vmatpush1.msra.mxu1 %v1846_v17 }
0x160f   :  { %1901 = vmatprep.subr.mxu1 %v1845_v0 }
0x1610   :  { %1902 = vmatpush1.msra.mxu1 %v1844_v22 }
0x1611   :  { %v2188_v44 = vpop.eup %2187  ;;  %1903 = vmatprep.subr.mxu1 %v1843_v5 }
0x1612   :  { %1812 = vrot.lane.b32.xlu1 %v2188_v44, %s2248_s7  ;;  %v2190_v47 = vpop.eup %2189  ;;  %1904 = vmatpush1.msra.mxu1 %v1842_v25 }
0x1613   :  { %v1803_v48 = vadd.f32 1.0, %v2190_v47 }
0x1615   :  { %2191 = vrcp.f32 %v1803_v48 }
0x1622   :  { %v2192_v49 = vpop.eup %2191 }
0x1623   :  { %v1810_v37 = vmul.f32 %v2192_v49, %v1605_v3 }
0x1684   :  { %v1813_v50 = vpop.permute.xlu1 %1812 }
0x1685   :  { %v1815_v51 = vmul.f32 %v2192_v49, %v1813_v50 }
0x1687   :  { %1817 = vrot.lane.b32.xlu0 %v1815_v51, %s2248_s7 }
0x168b   :  { %1829 = vrot.lane.b32.xlu0 %v1714_v35, %s2248_s7 }
0x16f9   :  { %v1818_v34 = vpop.permute.xlu0 %1817 }
0x16fa   :  { %v1820_v16 = vadd.f32 %v1818_v34, %v1810_v37 }
0x16fc   :  { %2193 = vtanh.f32 %v1820_v16 }
0x16fd   :  { %v1830_v6 = vpop.permute.xlu0 %1829  ;;  %2195 = vpow2.f32 %v2003_v61 }
0x16fe   :  { %1832 = vst.msk [vmem:[#allocation2 + $0x8] sm:$0xff] %vm27_vm0, %v1830_v6 }
0x1709   :  { %v2194_v20 = vpop.eup %2193 }
0x170a   :  { %1823 = vrot.lane.b32.xlu1 %v2194_v20, %s2248_s7  ;;  %v2196_v35 = vpop.eup %2195 }
0x170b   :  { %v1804_v59 = vadd.f32 1.0, %v2196_v35 }
0x170d   :  { %2197 = vrcp.f32 %v1804_v59 }
0x170e   :  { %1835 = vrot.lane.b32.xlu1 %v1820_v16, %s2248_s7 }
0x171a   :  { %v2198_v19 = vpop.eup %2197 }
0x177c   :  { %v1824_v1 = vpop.permute.xlu1 %1823 }
0x177d   :  { %v1826_v4 = vmul.f32 %v2198_v19, %v1824_v1 }
0x177f   :  { %1833 = vst.msk [vmem:[#allocation2 + $0x10] sm:$0xff] %vm27_vm0, %v1826_v4  ;;  %2004 = vmatmul.mubr.msk.f32.vlgmr.msra.gmra.mxu1 %vm27_vm0, %v1826_v4 }
0x1780   :  { %v1836_v15 = vpop.permute.xlu1 %1835 }
0x1781   :  { %1838 = vst.msk [vmem:[#allocation2 + $0x18] sm:$0xff] %vm27_vm0, %v1836_v15 }
0x183f   :  { %v1939_v18 = vpop.f32.mrf.mxu1 }
0x1840   :  { %v1940_v8 = vadd.f32 %v1939_v18, %v1863_v60 }
0x1841   :  { %v1941_v9 = vpop.f32.mrf.mxu1 }
0x1842   :  { %1944 = vst [vmem:[%s3499_s6] sm:$0xff] %v1940_v8  ;;  %v1942_v10 = vadd.f32 %v1941_v9, %v1867_v57 }
0x1844   :  { %1945 = vst [vmem:[%s3499_s6 + $0x8] sm:$0xff] %v1942_v10 }

</bundles_post_ra>
